<compile_context>
chip_gen: v7x
topology: tpu7x:2x2x1
jax: 0.10.0
libtpu: 0.0.40
codegen_flags: <defaults>
</compile_context>

<pallas_src>
import functools

import jax
import jax.numpy as jnp
from jax.experimental import pallas as pl
from jax.experimental.pallas import tpu as pltpu

H1, H2 = 400, 300


def _round_up(x, m):
    return (x + m - 1) // m * m


def _actor_kernel(h1p, h2p, ap,
                  ma_ref, x_ref, w1_ref, w2_ref, w3_ref, b_ref,
                  o_ref):
    max_action = ma_ref[0, 0]                      # SMEM scalar read (free)

    # Static, lane-aligned slices of the fused f32 bias buffer.
    b1 = b_ref[:, pl.ds(0, h1p)]
    b2 = b_ref[:, pl.ds(h1p, h2p)]
    b3 = b_ref[:, pl.ds(h1p + h2p, ap)]

    # Accept either f32 or bf16 activations; only cast when needed.
    xv = x_ref[...]
    if xv.dtype != jnp.bfloat16:
        xv = xv.astype(jnp.bfloat16)

    # Layer 1: Linear(state, 512) + ReLU  (bf16 MXU, f32 accumulate)
    h = jnp.dot(xv, w1_ref[...], preferred_element_type=jnp.float32)
    h = jnp.maximum(h + b1, 0.0)

    # Layer 2: Linear(512, 384) + ReLU
    h = jnp.dot(h.astype(jnp.bfloat16), w2_ref[...],
                preferred_element_type=jnp.float32)
    h = jnp.maximum(h + b2, 0.0)

    # Layer 3: Linear(384, 128), then max_action * tanh(.)
    h = jnp.dot(h.astype(jnp.bfloat16), w3_ref[...],
                preferred_element_type=jnp.float32)
    o_ref[...] = (max_action * jnp.tanh(h + b3)).astype(o_ref.dtype)


def _choose_batch_tiling(batch):
    """Return (tile_b, b_pad).

    Tiny (acting) batches: one grid step, rows padded to a sublane multiple.
    Training batches: at least 2 grid steps (v7x megacore sharding of the
    "parallel" batch axis), tile capped at 512 rows for v5e/v6e step-overhead
    amortization.  VMEM at tile_b=512 is only a few MiB, well under limits.
    """
    if batch <= 128:
        tile_b = _round_up(batch, 8)
        return tile_b, tile_b
    tile_b = min(512, _round_up(pl.cdiv(batch, 2), 8))
    b_pad = _round_up(batch, tile_b)
    return tile_b, b_pad


def actor_forward(x, padded_params, max_action, *, action_dim):
    """Actor MLP forward.  x: [B, state_dim] f32/bf16 -> [B, action_dim] f32."""
    w1, w2, w3, b_cat = padded_params
    s_pad, h1p = w1.shape
    h2p = w2.shape[1]
    ap = w3.shape[1]
    batch, state_dim = x.shape

    tile_b, b_pad = _choose_batch_tiling(batch)
    grid = (b_pad // tile_b,)

    # Only materialize a padded copy of x when it is not already aligned
    # (saves a full extra HBM read+write pass over x per call).
    if batch == b_pad and state_dim == s_pad:
        x_in = x
    else:
        x_in = jnp.zeros((b_pad, s_pad), x.dtype).at[:batch, :state_dim].set(x)

    ma = jnp.full((1, 1), max_action, dtype=jnp.float32)
    kernel = functools.partial(_actor_kernel, h1p, h2p, ap)

    flops = 2 * b_pad * (s_pad * h1p + h1p * h2p + h2p * ap)
    bytes_accessed = (
        2 * (w1.size + w2.size + w3.size)            # bf16 weights
        + 4 * b_cat.size                             # f32 fused biases
        + x_in.dtype.itemsize * x_in.size            # input
        + 4 * b_pad * ap                             # f32 output
    )

    def _invoke(single_buffer_residents):
        if single_buffer_residents:
            def resident(shape):
                # Constant (0,0) index_map: block never changes, so one buffer
                # is enough -> halves resident VMEM and drops dead DMAs.
                return pl.BlockSpec(shape, lambda i: (0, 0),
                                    pipeline_mode=pl.Buffered(buffer_count=1))
        else:
            def resident(shape):
                return pl.BlockSpec(shape, lambda i: (0, 0))

        return pl.pallas_call(
            kernel,
            out_shape=jax.ShapeDtypeStruct((b_pad, ap), jnp.float32),
            grid_spec=pltpu.PrefetchScalarGridSpec(
                num_scalar_prefetch=0,
                grid=grid,
                in_specs=[
                    pl.BlockSpec(memory_space=pltpu.MemorySpace.SMEM),  # max_action
                    pl.BlockSpec((tile_b, s_pad), lambda i: (i, 0)),    # x tile
                    resident(w1.shape),                                 # resident w1
                    resident(w2.shape),                                 # resident w2
                    resident(w3.shape),                                 # resident w3
                    resident(b_cat.shape),                              # fused biases
                ],
                out_specs=pl.BlockSpec((tile_b, ap), lambda i: (i, 0)),
            ),
            compiler_params=pltpu.CompilerParams(
                dimension_semantics=("parallel",)),
            cost_estimate=pl.CostEstimate(
                flops=flops,
                transcendentals=b_pad * ap,
                bytes_accessed=bytes_accessed),
        )(ma, x_in, w1, w2, w3, b_cat)

    try:
        out = _invoke(True)
    except Exception:
        # Fallback for JAX versions where pipeline_mode=pl.Buffered(1) is not
        # supported in top-level pallas_call specs: default double-buffering.
        out = _invoke(False)

    # Slice the real (unpadded) batch rows / action columns back out.
    return out[:batch, :action_dim]


def init_actor_params(key, state_dim, action_dim):
    """PyTorch-style U(-1/sqrt(fan_in), 1/sqrt(fan_in)) init for the real
    shapes, zero-padded to TPU-friendly shapes.  Weights -> bf16, biases stay
    f32 and are fused into one [1, h1p+h2p+ap] buffer."""
    s_pad = _round_up(state_dim, 16)   # bf16 sublane packing for w1's K dim
    h1p = _round_up(H1, 128)           # 512
    h2p = _round_up(H2, 128)           # 384
    ap = _round_up(action_dim, 128)    # 128

    def linear(k, fan_in, fan_out, in_pad, out_pad):
        kw, kb = jax.random.split(k)
        bound = float(fan_in) ** -0.5
        w = jax.random.uniform(kw, (fan_in, fan_out), jnp.float32, -bound, bound)
        b = jax.random.uniform(kb, (1, fan_out), jnp.float32, -bound, bound)
        w_pad = jnp.zeros((in_pad, out_pad), jnp.float32)
        w_pad = w_pad.at[:fan_in, :fan_out].set(w)
        b_pad = jnp.zeros((1, out_pad), jnp.float32).at[:, :fan_out].set(b)
        return w_pad.astype(jnp.bfloat16), b_pad

    k1, k2, k3 = jax.random.split(key, 3)
    w1, b1 = linear(k1, state_dim, H1, s_pad, h1p)
    w2, b2 = linear(k2, H1, H2, h1p, h2p)
    w3, b3 = linear(k3, H2, action_dim, h2p, ap)
    b_cat = jnp.concatenate([b1, b2, b3], axis=1)   # [1, h1p + h2p + ap]
    return (w1, w2, w3, b_cat)


def actor_reference(x, padded_params, max_action, *, action_dim):
    """Pure-JAX reference mirroring the kernel's numerics (bf16 matmul inputs,
    f32 accumulation) for a tight correctness check."""
    w1, w2, w3, b_cat = padded_params
    h1p, h2p = w1.shape[1], w2.shape[1]
    b1 = b_cat[:, :h1p]
    b2 = b_cat[:, h1p:h1p + h2p]
    b3 = b_cat[:, h1p + h2p:]

    batch, state_dim = x.shape
    s_pad = w1.shape[0]
    x_pad = jnp.zeros((batch, s_pad), jnp.float32).at[:, :state_dim].set(
        x.astype(jnp.float32))

    h = jnp.maximum(jnp.dot(x_pad.astype(jnp.bfloat16), w1,
                            preferred_element_type=jnp.float32) + b1, 0.0)
    h = jnp.maximum(jnp.dot(h.astype(jnp.bfloat16), w2,
                            preferred_element_type=jnp.float32) + b2, 0.0)
    h = jnp.dot(h.astype(jnp.bfloat16), w3,
                preferred_element_type=jnp.float32) + b3
    return (max_action * jnp.tanh(h))[:, :action_dim]


if __name__ == "__main__":
    state_dim = 16
    action_dim = 4
    max_action = 2.0

    key = jax.random.PRNGKey(0)
    k_params, k_x1, k_x2 = jax.random.split(key, 3)

    params = init_actor_params(k_params, state_dim, action_dim)

    # 1) Tiny "acting" batch: single grid step, padded to 8 rows.
    x_small = jax.random.normal(k_x1, (2, state_dim), jnp.float32)
    out_small = jax.block_until_ready(
        actor_forward(x_small, params, max_action, action_dim=action_dim))
    ref_small = actor_reference(x_small, params, max_action, action_dim=action_dim)
    assert out_small.shape == (2, action_dim), out_small.shape
    assert jnp.allclose(out_small, ref_small, atol=2e-2, rtol=2e-2), \
        "mismatch vs reference (small batch)"

    # 2) "Training" batch of 256: exercises the 2-step grid (v7x megacore path)
    #    and the no-copy aligned-input path.
    x_big = jax.random.normal(k_x2, (256, state_dim), jnp.float32)
    out_big = jax.block_until_ready(
        actor_forward(x_big, params, max_action, action_dim=action_dim))
    ref_big = actor_reference(x_big, params, max_action, action_dim=action_dim)
    assert out_big.shape == (256, action_dim), out_big.shape
    assert jnp.allclose(out_big, ref_big, atol=2e-2, rtol=2e-2), \
        "mismatch vs reference (large batch)"

    print("KERNEL_OK")
</pallas_src>

<mosaic_0001>
module attributes {stable_mosaic.version = 11 : i64} {
  func.func @_actor_kernel(%arg0: i32, %arg1: memref<1x1xf32, #tpu.memory_space<smem>>, %arg2: memref<8x16xf32, #tpu.memory_space<vmem>>, %arg3: memref<16x512xbf16, #tpu.memory_space<vmem>>, %arg4: memref<512x384xbf16, #tpu.memory_space<vmem>>, %arg5: memref<384x128xbf16, #tpu.memory_space<vmem>>, %arg6: memref<1x1024xf32, #tpu.memory_space<vmem>>, %arg7: memref<8x128xf32, #tpu.memory_space<vmem>>) attributes {dimension_semantics = [#tpu.dimension_semantics<parallel>], iteration_bounds = array<i64: 1>, scalar_prefetch = 0 : i64, scratch_operands = 0 : i64, tpu.core_type = #tpu.core_type<tc>, window_params = [{transform_indices = @transform_0, window_bounds = array<i64: 1, 1>}, {transform_indices = @transform_1, window_bounds = array<i64: 8, 16>}, {pipeline_mode = #tpu.pipeline_mode<synchronous>, transform_indices = @transform_2, window_bounds = array<i64: 16, 512>}, {pipeline_mode = #tpu.pipeline_mode<synchronous>, transform_indices = @transform_3, window_bounds = array<i64: 512, 384>}, {pipeline_mode = #tpu.pipeline_mode<synchronous>, transform_indices = @transform_4, window_bounds = array<i64: 384, 128>}, {pipeline_mode = #tpu.pipeline_mode<synchronous>, transform_indices = @transform_5, window_bounds = array<i64: 1, 1024>}, {transform_indices = @transform_6, window_bounds = array<i64: 8, 128>}]} {
    %c0 = arith.constant 0 : index
    %c0_0 = arith.constant 0 : index
    %0 = memref.load %arg1[%c0, %c0_0] : memref<1x1xf32, #tpu.memory_space<smem>>
    %c0_1 = arith.constant 0 : index
    %c0_2 = arith.constant 0 : index
    %1 = vector.load %arg6[%c0_1, %c0_2] : memref<1x1024xf32, #tpu.memory_space<vmem>>, vector<1x512xf32>
    %c0_3 = arith.constant 0 : index
    %c512 = arith.constant 512 : index
    %2 = vector.load %arg6[%c0_3, %c512] : memref<1x1024xf32, #tpu.memory_space<vmem>>, vector<1x384xf32>
    %c0_4 = arith.constant 0 : index
    %c896 = arith.constant 896 : index
    %3 = vector.load %arg6[%c0_4, %c896] : memref<1x1024xf32, #tpu.memory_space<vmem>>, vector<1x128xf32>
    %c0_5 = arith.constant 0 : index
    %c0_6 = arith.constant 0 : index
    %4 = vector.load %arg2[%c0_5, %c0_6] : memref<8x16xf32, #tpu.memory_space<vmem>>, vector<8x16xf32>
    %5 = arith.truncf %4 : vector<8x16xf32> to vector<8x16xbf16>
    %c0_7 = arith.constant 0 : index
    %c0_8 = arith.constant 0 : index
    %6 = vector.load %arg3[%c0_7, %c0_8] : memref<16x512xbf16, #tpu.memory_space<vmem>>, vector<16x512xbf16>
    %cst = arith.constant dense<0.000000e+00> : vector<8x512xf32>
    %7 = tpu.matmul %5, %6, %cst {dimension_numbers = #tpu.dot_dimension_numbers<[1], [0], [0], [1], [0, 0, 1, 1], [], []>} : vector<8x16xbf16>, vector<16x512xbf16>, vector<8x512xf32> -> vector<8x512xf32>
    %8 = vector.broadcast %1 : vector<1x512xf32> to vector<8x512xf32>
    %9 = arith.addf %7, %8 : vector<8x512xf32>
    %cst_9 = arith.constant 0.000000e+00 : f32
    %10 = vector.broadcast %cst_9 : f32 to vector<8x512xf32>
    %11 = arith.maximumf %9, %10 : vector<8x512xf32>
    %12 = arith.truncf %11 : vector<8x512xf32> to vector<8x512xbf16>
    %c0_10 = arith.constant 0 : index
    %c0_11 = arith.constant 0 : index
    %13 = vector.load %arg4[%c0_10, %c0_11] : memref<512x384xbf16, #tpu.memory_space<vmem>>, vector<512x384xbf16>
    %cst_12 = arith.constant dense<0.000000e+00> : vector<8x384xf32>
    %14 = tpu.matmul %12, %13, %cst_12 {dimension_numbers = #tpu.dot_dimension_numbers<[1], [0], [0], [1], [0, 0, 1, 1], [], []>} : vector<8x512xbf16>, vector<512x384xbf16>, vector<8x384xf32> -> vector<8x384xf32>
    %15 = vector.broadcast %2 : vector<1x384xf32> to vector<8x384xf32>
    %16 = arith.addf %14, %15 : vector<8x384xf32>
    %cst_13 = arith.constant 0.000000e+00 : f32
    %17 = vector.broadcast %cst_13 : f32 to vector<8x384xf32>
    %18 = arith.maximumf %16, %17 : vector<8x384xf32>
    %19 = arith.truncf %18 : vector<8x384xf32> to vector<8x384xbf16>
    %c0_14 = arith.constant 0 : index
    %c0_15 = arith.constant 0 : index
    %20 = vector.load %arg5[%c0_14, %c0_15] : memref<384x128xbf16, #tpu.memory_space<vmem>>, vector<384x128xbf16>
    %cst_16 = arith.constant dense<0.000000e+00> : vector<8x128xf32>
    %21 = tpu.matmul %19, %20, %cst_16 {dimension_numbers = #tpu.dot_dimension_numbers<[1], [0], [0], [1], [0, 0, 1, 1], [], []>} : vector<8x384xbf16>, vector<384x128xbf16>, vector<8x128xf32> -> vector<8x128xf32>
    %22 = vector.broadcast %3 : vector<1x128xf32> to vector<8x128xf32>
    %23 = arith.addf %21, %22 : vector<8x128xf32>
    %24 = math.tanh %23 : vector<8x128xf32>
    %25 = vector.broadcast %0 : f32 to vector<8x128xf32>
    %26 = arith.mulf %25, %24 : vector<8x128xf32>
    %c0_17 = arith.constant 0 : index
    %c0_18 = arith.constant 0 : index
    %27 = vector.load %arg7[%c0_17, %c0_18] : memref<8x128xf32, #tpu.memory_space<vmem>>, vector<8x128xf32>
    tpu.vector_store %arg7[%c0_17, %c0_18], %26 {strides = array<i32>} : memref<8x128xf32, #tpu.memory_space<vmem>>, vector<8x128xf32>,
    return
  }
  func.func @transform_0(%arg0: i32) -> (i32, i32) {
    %c0_i32 = arith.constant 0 : i32
    %c0_i32_0 = arith.constant 0 : i32
    %c0_i32_1 = arith.constant 0 : i32
    return %c0_i32, %c0_i32_0 : i32, i32
  }
  func.func @transform_1(%arg0: i32) -> (i32, i32) {
    %c0_i32 = arith.constant 0 : i32
    %c0_i32_0 = arith.constant 0 : i32
    return %arg0, %c0_i32 : i32, i32
  }
  func.func @transform_2(%arg0: i32) -> (i32, i32) {
    %c0_i32 = arith.constant 0 : i32
    %c0_i32_0 = arith.constant 0 : i32
    %c0_i32_1 = arith.constant 0 : i32
    return %c0_i32, %c0_i32_0 : i32, i32
  }
  func.func @transform_3(%arg0: i32) -> (i32, i32) {
    %c0_i32 = arith.constant 0 : i32
    %c0_i32_0 = arith.constant 0 : i32
    %c0_i32_1 = arith.constant 0 : i32
    return %c0_i32, %c0_i32_0 : i32, i32
  }
  func.func @transform_4(%arg0: i32) -> (i32, i32) {
    %c0_i32 = arith.constant 0 : i32
    %c0_i32_0 = arith.constant 0 : i32
    %c0_i32_1 = arith.constant 0 : i32
    return %c0_i32, %c0_i32_0 : i32, i32
  }
  func.func @transform_5(%arg0: i32) -> (i32, i32) {
    %c0_i32 = arith.constant 0 : i32
    %c0_i32_0 = arith.constant 0 : i32
    %c0_i32_1 = arith.constant 0 : i32
    return %c0_i32, %c0_i32_0 : i32, i32
  }
  func.func @transform_6(%arg0: i32) -> (i32, i32) {
    %c0_i32 = arith.constant 0 : i32
    %c0_i32_0 = arith.constant 0 : i32
    return %arg0, %c0_i32 : i32, i32
  }
}

module attributes {stable_mosaic.version = 11 : i64} {
  func.func @_actor_kernel(%arg0: i32, %arg1: memref<1x1xf32, #tpu.memory_space<smem>>, %arg2: memref<8x16xf32, #tpu.memory_space<vmem>>, %arg3: memref<16x512xbf16, #tpu.memory_space<vmem>>, %arg4: memref<512x384xbf16, #tpu.memory_space<vmem>>, %arg5: memref<384x128xbf16, #tpu.memory_space<vmem>>, %arg6: memref<1x1024xf32, #tpu.memory_space<vmem>>, %arg7: memref<8x128xf32, #tpu.memory_space<vmem>>) attributes {dimension_semantics = [#tpu.dimension_semantics<parallel>], iteration_bounds = array<i64: 1>, scalar_prefetch = 0 : i64, scratch_operands = 0 : i64, tpu.core_type = #tpu.core_type<tc>, window_params = [{transform_indices = @transform_0, window_bounds = array<i64: 1, 1>}, {transform_indices = @transform_1, window_bounds = array<i64: 8, 16>}, {pipeline_mode = #tpu.pipeline_mode<synchronous>, transform_indices = @transform_2, window_bounds = array<i64: 16, 512>}, {pipeline_mode = #tpu.pipeline_mode<synchronous>, transform_indices = @transform_3, window_bounds = array<i64: 512, 384>}, {pipeline_mode = #tpu.pipeline_mode<synchronous>, transform_indices = @transform_4, window_bounds = array<i64: 384, 128>}, {pipeline_mode = #tpu.pipeline_mode<synchronous>, transform_indices = @transform_5, window_bounds = array<i64: 1, 1024>}, {transform_indices = @transform_6, window_bounds = array<i64: 8, 128>}]} {
    %c0 = arith.constant 0 : index
    %c0_0 = arith.constant 0 : index
    %0 = memref.load %arg1[%c0, %c0_0] : memref<1x1xf32, #tpu.memory_space<smem>>
    %c0_1 = arith.constant 0 : index
    %c0_2 = arith.constant 0 : index
    %1 = vector.load %arg6[%c0_1, %c0_2] : memref<1x1024xf32, #tpu.memory_space<vmem>>, vector<1x512xf32>
    %c0_3 = arith.constant 0 : index
    %c512 = arith.constant 512 : index
    %2 = vector.load %arg6[%c0_3, %c512] : memref<1x1024xf32, #tpu.memory_space<vmem>>, vector<1x384xf32>
    %c0_4 = arith.constant 0 : index
    %c896 = arith.constant 896 : index
    %3 = vector.load %arg6[%c0_4, %c896] : memref<1x1024xf32, #tpu.memory_space<vmem>>, vector<1x128xf32>
    %c0_5 = arith.constant 0 : index
    %c0_6 = arith.constant 0 : index
    %4 = vector.load %arg2[%c0_5, %c0_6] : memref<8x16xf32, #tpu.memory_space<vmem>>, vector<8x16xf32>
    %5 = arith.truncf %4 : vector<8x16xf32> to vector<8x16xbf16>
    %c0_7 = arith.constant 0 : index
    %c0_8 = arith.constant 0 : index
    %6 = vector.load %arg3[%c0_7, %c0_8] : memref<16x512xbf16, #tpu.memory_space<vmem>>, vector<16x512xbf16>
    %cst = arith.constant dense<0.000000e+00> : vector<8x512xf32>
    %7 = tpu.matmul %5, %6, %cst {dimension_numbers = #tpu.dot_dimension_numbers<[1], [0], [0], [1], [0, 0, 1, 1], [], []>} : vector<8x16xbf16>, vector<16x512xbf16>, vector<8x512xf32> -> vector<8x512xf32>
    %8 = vector.broadcast %1 : vector<1x512xf32> to vector<8x512xf32>
    %9 = arith.addf %7, %8 : vector<8x512xf32>
    %cst_9 = arith.constant 0.000000e+00 : f32
    %10 = vector.broadcast %cst_9 : f32 to vector<8x512xf32>
    %11 = arith.maximumf %9, %10 : vector<8x512xf32>
    %12 = arith.truncf %11 : vector<8x512xf32> to vector<8x512xbf16>
    %c0_10 = arith.constant 0 : index
    %c0_11 = arith.constant 0 : index
    %13 = vector.load %arg4[%c0_10, %c0_11] : memref<512x384xbf16, #tpu.memory_space<vmem>>, vector<512x384xbf16>
    %cst_12 = arith.constant dense<0.000000e+00> : vector<8x384xf32>
    %14 = tpu.matmul %12, %13, %cst_12 {dimension_numbers = #tpu.dot_dimension_numbers<[1], [0], [0], [1], [0, 0, 1, 1], [], []>} : vector<8x512xbf16>, vector<512x384xbf16>, vector<8x384xf32> -> vector<8x384xf32>
    %15 = vector.broadcast %2 : vector<1x384xf32> to vector<8x384xf32>
    %16 = arith.addf %14, %15 : vector<8x384xf32>
    %cst_13 = arith.constant 0.000000e+00 : f32
    %17 = vector.broadcast %cst_13 : f32 to vector<8x384xf32>
    %18 = arith.maximumf %16, %17 : vector<8x384xf32>
    %19 = arith.truncf %18 : vector<8x384xf32> to vector<8x384xbf16>
    %c0_14 = arith.constant 0 : index
    %c0_15 = arith.constant 0 : index
    %20 = vector.load %arg5[%c0_14, %c0_15] : memref<384x128xbf16, #tpu.memory_space<vmem>>, vector<384x128xbf16>
    %cst_16 = arith.constant dense<0.000000e+00> : vector<8x128xf32>
    %21 = tpu.matmul %19, %20, %cst_16 {dimension_numbers = #tpu.dot_dimension_numbers<[1], [0], [0], [1], [0, 0, 1, 1], [], []>} : vector<8x384xbf16>, vector<384x128xbf16>, vector<8x128xf32> -> vector<8x128xf32>
    %22 = vector.broadcast %3 : vector<1x128xf32> to vector<8x128xf32>
    %23 = arith.addf %21, %22 : vector<8x128xf32>
    %24 = math.tanh %23 : vector<8x128xf32>
    %25 = vector.broadcast %0 : f32 to vector<8x128xf32>
    %26 = arith.mulf %25, %24 : vector<8x128xf32>
    %c0_17 = arith.constant 0 : index
    %c0_18 = arith.constant 0 : index
    %27 = vector.load %arg7[%c0_17, %c0_18] : memref<8x128xf32, #tpu.memory_space<vmem>>, vector<8x128xf32>
    tpu.vector_store %arg7[%c0_17, %c0_18], %26 {strides = array<i32>} : memref<8x128xf32, #tpu.memory_space<vmem>>, vector<8x128xf32>,
    return
  }
  func.func @transform_0(%arg0: i32) -> (i32, i32) {
    %c0_i32 = arith.constant 0 : i32
    %c0_i32_0 = arith.constant 0 : i32
    %c0_i32_1 = arith.constant 0 : i32
    return %c0_i32, %c0_i32_0 : i32, i32
  }
  func.func @transform_1(%arg0: i32) -> (i32, i32) {
    %c0_i32 = arith.constant 0 : i32
    %c0_i32_0 = arith.constant 0 : i32
    return %arg0, %c0_i32 : i32, i32
  }
  func.func @transform_2(%arg0: i32) -> (i32, i32) {
    %c0_i32 = arith.constant 0 : i32
    %c0_i32_0 = arith.constant 0 : i32
    %c0_i32_1 = arith.constant 0 : i32
    return %c0_i32, %c0_i32_0 : i32, i32
  }
  func.func @transform_3(%arg0: i32) -> (i32, i32) {
    %c0_i32 = arith.constant 0 : i32
    %c0_i32_0 = arith.constant 0 : i32
    %c0_i32_1 = arith.constant 0 : i32
    return %c0_i32, %c0_i32_0 : i32, i32
  }
  func.func @transform_4(%arg0: i32) -> (i32, i32) {
    %c0_i32 = arith.constant 0 : i32
    %c0_i32_0 = arith.constant 0 : i32
    %c0_i32_1 = arith.constant 0 : i32
    return %c0_i32, %c0_i32_0 : i32, i32
  }
  func.func @transform_5(%arg0: i32) -> (i32, i32) {
    %c0_i32 = arith.constant 0 : i32
    %c0_i32_0 = arith.constant 0 : i32
    %c0_i32_1 = arith.constant 0 : i32
    return %c0_i32, %c0_i32_0 : i32, i32
  }
  func.func @transform_6(%arg0: i32) -> (i32, i32) {
    %c0_i32 = arith.constant 0 : i32
    %c0_i32_0 = arith.constant 0 : i32
    return %arg0, %c0_i32 : i32, i32
  }
}

</mosaic_0001>

<bundles_post_ra>
// kernel: tpu_custom_call.1
= control target key start
LH: loop header
LB: loop body
LE: loop exit
PB: predicated region body
PF: predicated region fallthrough
CT: control target
= control target key end

     0   :  { %12 = vsyncpa [#allocation4], 0  ;;  %s2015_s0 = inlined_call_operand.<no memory space> [shape: f32[1,1], index: 0, kind: input, shape index: {}]   ;;  %s2016_s1 = inlined_call_operand.hbm [shape: f32[8,16], index: 1, kind: input, shape index: {}]   ;;  %s2017_s2 = inlined_call_operand.hbm [shape: bf16[16,512], index: 2, kind: input, shape index: {}]   ;;  %s2018_s3 = inlined_call_operand.hbm [shape: bf16[512,384], index: 3, kind: input, shape index: {}]   ;;  %s2019_s4 = inlined_call_operand.hbm [shape: bf16[384,128], index: 4, kind: input, shape index: {}]   ;;  %s2020_s5 = inlined_call_operand.vmem [shape: f32[1,1024], index: 5, kind: input, shape index: {}]   ;;  %s2021_s6 = inlined_call_operand.hbm [shape: f32[8,128], index: 6, kind: output, shape index: {}]  }
   0x1   :  { %13 = vsyncpa [#allocation7], 0 }
   0x2   :  { %14 = vsyncpa [#allocation10], 0 }
   0x3   :  { %15 = vsyncpa [#allocation5], 0  ;;  %s1867_s21 = smov [#allocation6]   ;;  %s1749_s25 = scalar_lea.hbm %s2017_s2, 512 }
   0x4   :  { %s33_s22 = sshll.u32 %s1867_s21, 4  ;;  %p1750_p0 = scmp.ne.s32.totalorder %s2017_s2, %s1749_s25  ;;  %s34_s22 = int_to_ptr.vmem [resolvable:$true] %s33_s22 }
   0x5   :  { %p1753_p1 = scmp.lt.u32.totalorder %s1749_s25, %s2017_s2 }
   0x7   :  { %p1755_p2 = pnand %p1753_p1, %p1750_p0 }
   0x9   :  { %1758 = shalt.err (!%p1755_p2)
}
   0xa   :  { %s1759_s30 = scalar_lea.vmem %s34_s22, 512  ;;  %p1764_p4 = scmp.lt.s32.totalorder %s34_s22, %s34_s22 }
   0xb   :  { %p1760_p3 = scmp.ne.s32.totalorder %s34_s22, %s1759_s30  ;;  %p1765_p5 = scmp.lt.s32.totalorder %s1759_s30, %s1759_s30 }
   0xd   :  { %p1766_p6 = por %p1765_p5, %p1764_p4 }
   0xf   :  { %p1767_p7 = pnand %p1766_p6, %p1760_p3 }
  0x11   :  { %1770 = shalt.err (!%p1767_p7)
}
  0x12   :  { %s1868_s7 = smov 256   ;;  %s1869_s8 = smov 16  }
  0x13   :  { %39 = dma.hbm_to_vmem [thread:$0]  %s2017_s2, 512, %s34_s22, [#allocation7], %s1868_s7, %s1868_s7, %s1869_s8  }
  0x14   :  { %s1870_s11 = smov [#allocation3]   ;;  %s1871_s13 = smov [#allocation8]  }
  0x15   :  { %s24_s12 = sshll.u32 %s1870_s11, 4  ;;  %s45_s14 = sshll.u32 %s1871_s13, 4  ;;  %s25_s12 = int_to_ptr.vmem [resolvable:$true] %s24_s12  ;;  %s46_s14 = int_to_ptr.vmem [resolvable:$true] %s45_s14 }
  0x16   :  { %s1771_s17 = scalar_lea.hbm %s2016_s1, 128 }
  0x17   :  { %p1772_p8 = scmp.ne.s32.totalorder %s2016_s1, %s1771_s17  ;;  %p1775_p9 = scmp.lt.u32.totalorder %s1771_s17, %s2016_s1 }
  0x19   :  { %p1777_p10 = pnand %p1775_p9, %p1772_p8 }
  0x1b   :  { %1780 = shalt.err (!%p1777_p10)
}
  0x1c   :  { %s1781_s2 = scalar_lea.vmem %s25_s12, 128  ;;  %p1786_p12 = scmp.lt.s32.totalorder %s25_s12, %s25_s12 }
  0x1d   :  { %p1782_p11 = scmp.ne.s32.totalorder %s25_s12, %s1781_s2  ;;  %p1787_p13 = scmp.lt.s32.totalorder %s1781_s2, %s1781_s2 }
  0x1f   :  { %p1788_p0 = por %p1787_p13, %p1786_p12 }
  0x21   :  { %p1789_p1 = pnand %p1788_p0, %p1782_p11 }
  0x23   :  { %1792 = shalt.err (!%p1789_p1)
}
  0x24   :  { %27 = dma.hbm_to_vmem [thread:$0]  %s2016_s1, 128, %s25_s12, [#allocation4]  }
  0x25   :  { %s1793_s26 = scalar_lea.hbm %s2018_s3, 12288 }
  0x26   :  { %p1794_p2 = scmp.ne.s32.totalorder %s2018_s3, %s1793_s26  ;;  %p1797_p3 = scmp.lt.u32.totalorder %s1793_s26, %s2018_s3 }
  0x28   :  { %p1799_p4 = pnand %p1797_p3, %p1794_p2 }
  0x2a   :  { %1802 = shalt.err (!%p1799_p4)
}
  0x2b   :  { %s1803_s7 = scalar_lea.vmem %s46_s14, 12288  ;;  %p1808_p6 = scmp.lt.s32.totalorder %s46_s14, %s46_s14 }
  0x2c   :  { %p1804_p5 = scmp.ne.s32.totalorder %s46_s14, %s1803_s7  ;;  %p1809_p7 = scmp.lt.s32.totalorder %s1803_s7, %s1803_s7 }
  0x2e   :  { %p1810_p8 = por %p1809_p7, %p1808_p6 }
  0x30   :  { %p1811_p9 = pnand %p1810_p8, %p1804_p5 }
  0x32   :  { %1814 = shalt.err (!%p1811_p9)
}
  0x33   :  { %s1872_s1 = smov 192   ;;  %s1873_s8 = smov 12  }
  0x34   :  { %51 = dma.hbm_to_vmem [thread:$0]  %s2018_s3, 12288, %s46_s14, [#allocation7], %s1872_s1, %s1872_s1, %s1873_s8  }
  0x35   :  { %s1874_s11 = smov [#allocation9]   ;;  %s1815_s16 = scalar_lea.hbm %s2019_s4, 3072 }
  0x36   :  { %s57_s12 = sshll.u32 %s1874_s11, 4  ;;  %p1816_p10 = scmp.ne.s32.totalorder %s2019_s4, %s1815_s16  ;;  %s58_s12 = int_to_ptr.vmem [resolvable:$true] %s57_s12 }
  0x37   :  { %p1819_p11 = scmp.lt.u32.totalorder %s1815_s16, %s2019_s4 }
  0x39   :  { %p1821_p12 = pnand %p1819_p11, %p1816_p10 }
  0x3b   :  { %1824 = shalt.err (!%p1821_p12)
}
  0x3c   :  { %s1825_s21 = scalar_lea.vmem %s58_s12, 3072  ;;  %p1830_p0 = scmp.lt.s32.totalorder %s58_s12, %s58_s12 }
  0x3d   :  { %p1826_p13 = scmp.ne.s32.totalorder %s58_s12, %s1825_s21  ;;  %p1831_p1 = scmp.lt.s32.totalorder %s1825_s21, %s1825_s21 }
  0x3f   :  { %p1832_p2 = por %p1831_p1, %p1830_p0 }
  0x41   :  { %p1833_p3 = pnand %p1832_p2, %p1826_p13 }
  0x43   :  { %1836 = shalt.err (!%p1833_p3)
}
  0x44   :  { %s1875_s3 = smov 64   ;;  %s1876_s14 = smov 4  }
  0x45   :  { %63 = dma.hbm_to_vmem [thread:$0]  %s2019_s4, 3072, %s58_s12, [#allocation10], %s1875_s3, %s1875_s3, %s1876_s14  }
  0x46   :  { %1859 = dma.done.wait [#allocation4], 128  }
  0x47   :  { %1860 = vsyncadd [#allocation4], 4294967168 }
  0x48   :  { %1861 = dma.done.wait [#allocation7], 12800  }
  0x49   :  { %1862 = vsyncadd [#allocation7], 4294954496 }
  0x4a   :  { %1863 = dma.done.wait [#allocation10], 3072  }
  0x4b   :  { %1864 = vsyncadd [#allocation10], 4294964224  ;;  %v1877_v0 = vmov 0   ;;  %v1589_v1 = vld [vmem:[#allocation6 + $0x4] ss:$16 sps:$4 sm:$0xff]   ;;  %v83_v3 = vld [vmem:[#allocation3] sm:$0xff]  ;;  %v90_v57 = vlaneseq }
  0x4c   :  { %166 = vmatprep.mubr.bf16.mxu0 %v1877_v0  ;;  %207 = vmatprep.mubr.bf16.mxu1 %v1877_v0  ;;  %v1591_v2 = vld [vmem:[#allocation6] ss:$16 sps:$4 sm:$0xff]   ;;  %v84_v4 = vpack.c.bf16 %v83_v3, %v83_v3  ;;  %v1592_v5 = vld [vmem:[#allocation6 + $0xc] ss:$16 sps:$4 sm:$0xff]   ;;  %v1594_v6 = vld [vmem:[#allocation6 + $0x8] ss:$16 sps:$4 sm:$0xff]  }
  0x4d   :  { %134 = vmatprep.subr.bf16.mxu0 %v1589_v1  ;;  %vm130_vm0 = vcmask 130048   ;;  %v1595_v7 = vld [vmem:[#allocation8] ss:$12 sps:$4 sm:$0xff]   ;;  %175 = vmatprep.subr.bf16.mxu1 %v1592_v5  ;;  %v1597_v8 = vld [vmem:[#allocation8 + $0x4] ss:$12 sps:$4 sm:$0xff]   ;;  %v1964_v58 = vshrl.u32 %v90_v57, 7 }
  0x4e   :  { %135 = vmatpush1.bf16.msra.mxu0 %v1591_v2  ;;  %176 = vmatpush1.bf16.msra.mxu1 %v1594_v6  ;;  %v1600_v9 = vld [vmem:[#allocation8 + $0x1c] ss:$12 sps:$4 sm:$0xff]   ;;  %v1598_v10 = vld [vmem:[#allocation8 + $0x18] ss:$12 sps:$4 sm:$0xff]   ;;  %v1603_v11 = vld [vmem:[#allocation8 + $0x34] ss:$12 sps:$4 sm:$0xff]  }
  0x4f   :  { %880 = vmatprep.subr.bf16.mxu0 %v1597_v8  ;;  %v1601_v12 = vld [vmem:[#allocation8 + $0x30] ss:$12 sps:$4 sm:$0xff]   ;;  %v1606_v13 = vld [vmem:[#allocation8 + $0x4c] ss:$12 sps:$4 sm:$0xff]   ;;  %v1604_v14 = vld [vmem:[#allocation8 + $0x48] ss:$12 sps:$4 sm:$0xff]  }
  0x50   :  { %v1609_v15 = vld [vmem:[#allocation8 + $0x64] ss:$12 sps:$4 sm:$0xff]   ;;  %v1622_v16 = vld [vmem:[#allocation8 + $0xc8] ss:$12 sps:$4 sm:$0xff]   ;;  %v1607_v18 = vld [vmem:[#allocation8 + $0x60] ss:$12 sps:$4 sm:$0xff]  }
  0x51   :  { %1351 = vmatmul.mubr.msk.bf16.vlgmr.msra.gmra.mrb[0].mxu0 %vm130_vm0, %v84_v4  ;;  %1352 = vmatmul.mubr.msk.bf16.vlgmr.msra.gmra.mrb[0].mxu1 %vm130_vm0, %v84_v4  ;;  %v1623_v17 = vld [vmem:[#allocation8 + $0x8] ss:$12 sps:$4 sm:$0xff]   ;;  %v1627_v20 = vld [vmem:[#allocation8 + $0xe0] ss:$12 sps:$4 sm:$0xff]   ;;  %v1610_v22 = vld [vmem:[#allocation8 + $0x78] ss:$12 sps:$4 sm:$0xff]  }
  0x52   :  { %881 = vmatpush1.bf16.msra.mxu0 %v1595_v7  ;;  %1474 = vmatprep.subr.bf16.mxu1 %v1622_v16  ;;  %v1612_v19 = vld [vmem:[#allocation8 + $0x7c] ss:$12 sps:$4 sm:$0xff]   ;;  %v1628_v21 = vld [vmem:[#allocation8 + $0x20] ss:$12 sps:$4 sm:$0xff]   ;;  %v1632_v23 = vld [vmem:[#allocation8 + $0xf8] ss:$12 sps:$4 sm:$0xff]  }
  0x53   :  { %882 = vmatprep.subr.bf16.mxu0 %v1600_v9  ;;  %1475 = vmatpush3.bf16.msra.mxu1 %v1623_v17  ;;  %v1633_v24 = vld [vmem:[#allocation8 + $0x38] ss:$12 sps:$4 sm:$0xff]   ;;  %v1615_v25 = vld [vmem:[#allocation8 + $0x94] ss:$12 sps:$4 sm:$0xff]   ;;  %v1637_v26 = vld [vmem:[#allocation8 + $0x110] ss:$12 sps:$4 sm:$0xff]  }
  0x54   :  { %1476 = vmatprep.subr.bf16.mxu1 %v1627_v20  ;;  %v1638_v27 = vld [vmem:[#allocation8 + $0x50] ss:$12 sps:$4 sm:$0xff]   ;;  %v1618_v29 = vld [vmem:[#allocation8 + $0xac] ss:$12 sps:$4 sm:$0xff]   ;;  %v1642_v30 = vld [vmem:[#allocation8 + $0x128] ss:$12 sps:$4 sm:$0xff]  }
  0x55   :  { %v1613_v28 = vld [vmem:[#allocation8 + $0x90] ss:$12 sps:$4 sm:$0xff]   ;;  %v1643_v31 = vld [vmem:[#allocation8 + $0x68] ss:$12 sps:$4 sm:$0xff]   ;;  %v1647_v34 = vld [vmem:[#allocation8 + $0x140] ss:$12 sps:$4 sm:$0xff]  }
  0x56   :  { %883 = vmatpush1.bf16.msra.mxu0 %v1598_v10  ;;  %v1616_v32 = vld [vmem:[#allocation8 + $0xa8] ss:$12 sps:$4 sm:$0xff]   ;;  %v1621_v33 = vld [vmem:[#allocation8 + $0xc4] ss:$12 sps:$4 sm:$0xff]   ;;  %v1619_v35 = vld [vmem:[#allocation8 + $0xc0] ss:$12 sps:$4 sm:$0xff]  }
  0x57   :  { %884 = vmatprep.subr.bf16.mxu0 %v1603_v11  ;;  %1477 = vmatpush3.bf16.msra.mxu1 %v1628_v21  ;;  %v1648_v36 = vld [vmem:[#allocation8 + $0x80] ss:$12 sps:$4 sm:$0xff]   ;;  %v1626_v37 = vld [vmem:[#allocation8 + $0xdc] ss:$12 sps:$4 sm:$0xff]   ;;  %v1624_v38 = vld [vmem:[#allocation8 + $0xd8] ss:$12 sps:$4 sm:$0xff]  }
  0x58   :  { %1478 = vmatprep.subr.bf16.mxu1 %v1632_v23  ;;  %v1631_v39 = vld [vmem:[#allocation8 + $0xf4] ss:$12 sps:$4 sm:$0xff]   ;;  %v1629_v40 = vld [vmem:[#allocation8 + $0xf0] ss:$12 sps:$4 sm:$0xff]   ;;  %v1636_v41 = vld [vmem:[#allocation8 + $0x10c] ss:$12 sps:$4 sm:$0xff]  }
  0x59   :  { %v1634_v42 = vld [vmem:[#allocation8 + $0x108] ss:$12 sps:$4 sm:$0xff]   ;;  %v1641_v43 = vld [vmem:[#allocation8 + $0x124] ss:$12 sps:$4 sm:$0xff]   ;;  %v1639_v44 = vld [vmem:[#allocation8 + $0x120] ss:$12 sps:$4 sm:$0xff]  }
  0x5a   :  { %885 = vmatpush1.bf16.msra.mxu0 %v1601_v12  ;;  %v1646_v45 = vld [vmem:[#allocation8 + $0x13c] ss:$12 sps:$4 sm:$0xff]   ;;  %v1644_v46 = vld [vmem:[#allocation8 + $0x138] ss:$12 sps:$4 sm:$0xff]   ;;  %v1651_v47 = vld [vmem:[#allocation8 + $0x154] ss:$12 sps:$4 sm:$0xff]  }
  0x5b   :  { %886 = vmatprep.subr.bf16.mxu0 %v1606_v13  ;;  %1479 = vmatpush3.bf16.msra.mxu1 %v1633_v24  ;;  %v1652_v48 = vld [vmem:[#allocation8 + $0x158] ss:$12 sps:$4 sm:$0xff]   ;;  %v1649_v49 = vld [vmem:[#allocation8 + $0x150] ss:$12 sps:$4 sm:$0xff]   ;;  %v1654_v53 = vld [vmem:[#allocation8 + $0x168] ss:$12 sps:$4 sm:$0xff]  }
  0x5c   :  { %1480 = vmatprep.subr.bf16.mxu1 %v1637_v26  ;;  %v1653_v50 = vld [vmem:[#allocation8 + $0x98] ss:$12 sps:$4 sm:$0xff]   ;;  %v1657_v52 = vld [vmem:[#allocation8 + $0x170] ss:$12 sps:$4 sm:$0xff]   ;;  %v1662_v56 = vld [vmem:[#allocation8 + $0x248] ss:$12 sps:$4 sm:$0xff]  }
  0x5d   :  { %v1656_v51 = vld [vmem:[#allocation8 + $0x16c] ss:$12 sps:$4 sm:$0xff]   ;;  %v1658_v54 = vld [vmem:[#allocation8 + $0xb0] ss:$12 sps:$4 sm:$0xff]   ;;  %v92_v59 = vsub.s32 0, %v1964_v58  ;;  %v96_v61 = vsub.s32 1, %v1964_v58 }
  0x5e   :  { %887 = vmatpush1.bf16.msra.mxu0 %v1604_v14  ;;  %v1661_v55 = vld [vmem:[#allocation8 + $0x184] ss:$12 sps:$4 sm:$0xff]   ;;  %v1970_v60 = vld [vmem:[%s2020_s5] sm:$0xf]  ;;  %v104_v62 = vsub.s32 3, %v1964_v58  ;;  %vm1879_vm1 = vmmov 0  }
  0x5f   :  { %888 = vmatprep.subr.bf16.mxu0 %v1609_v15  ;;  %1481 = vmatpush3.bf16.msra.mxu1 %v1638_v27  ;;  %v93_v63 = vrot.slane %v1970_v60, %v92_v59  ;;  %v97_v0 = vrot.slane %v1970_v60, %v96_v61  ;;  %v1659_v16 = vld [vmem:[#allocation8 + $0x180] ss:$12 sps:$4 sm:$0xff]   ;;  %v1663_v17 = vld [vmem:[#allocation8 + $0x188] ss:$12 sps:$4 sm:$0xff]   ;;  %v1664_v23 = vld [vmem:[#allocation8 + $0x198] ss:$12 sps:$4 sm:$0xff]  }
  0x60   :  { %1482 = vmatprep.subr.bf16.mxu1 %v1642_v30  ;;  %v105_v2 = vrot.slane %v1970_v60, %v104_v62  ;;  %v1666_v20 = vld [vmem:[#allocation8 + $0x19c] ss:$12 sps:$4 sm:$0xff]   ;;  %v1667_v21 = vld [vmem:[#allocation8 + $0x260] ss:$12 sps:$4 sm:$0xff]   ;;  %v1672_v26 = vld [vmem:[#allocation8 + $0x278] ss:$12 sps:$4 sm:$0xff]  }
  0x61   :  { %v1668_v24 = vld [vmem:[#allocation8 + $0x1a0] ss:$12 sps:$4 sm:$0xff]   ;;  %v1669_v27 = vld [vmem:[#allocation8 + $0x1b0] ss:$12 sps:$4 sm:$0xff]   ;;  %v1702_v57 = vld [vmem:[#allocation8 + $0x258] ss:$12 sps:$4 sm:$0xff]  }
  0x62   :  { %889 = vmatpush1.bf16.msra.mxu0 %v1607_v18  ;;  %v1677_v30 = vld [vmem:[#allocation8 + $0x290] ss:$12 sps:$4 sm:$0xff]   ;;  %s1880_s30 = smov [#allocation11]  }
  0x63   :  { %890 = vmatprep.subr.bf16.mxu0 %v1612_v19  ;;  %1483 = vmatpush3.bf16.msra.mxu1 %v1643_v31  ;;  %v1674_v31 = vld [vmem:[#allocation8 + $0x1c8] ss:$12 sps:$4 sm:$0xff]   ;;  %v1705_v62 = vld [vmem:[#allocation8 + $0x270] ss:$12 sps:$4 sm:$0xff]   ;;  %s1336_s7 = sshll.u32 %s1880_s30, 4  ;;  %s1337_s7 = int_to_ptr.vmem [resolvable:$true] %s1336_s7 }
  0x64   :  { %1484 = vmatprep.subr.bf16.mxu1 %v1647_v34  ;;  %v1682_v34 = vld [vmem:[#allocation8 + $0x2a8] ss:$12 sps:$4 sm:$0xff]   ;;  %s1837_s1 = scalar_lea.vmem %s1337_s7, 128  ;;  %p1842_p5 = scmp.lt.s32.totalorder %s1337_s7, %s1337_s7 }
  0x65   :  { %p1838_p4 = scmp.ne.s32.totalorder %s1337_s7, %s1837_s1  ;;  %p1843_p6 = scmp.lt.s32.totalorder %s1837_s1, %s1837_s1 }
  0x66   :  { %891 = vmatpush1.bf16.msra.mxu0 %v1610_v22 }
  0x67   :  { %892 = vmatprep.subr.bf16.mxu0 %v1615_v25  ;;  %1485 = vmatpush3.bf16.msra.mxu1 %v1648_v36  ;;  %v1671_v25 = vld [vmem:[#allocation8 + $0x1b4] ss:$12 sps:$4 sm:$0xff]   ;;  %p1844_p7 = por %p1843_p6, %p1842_p5 }
  0x68   :  { %1486 = vmatprep.subr.bf16.mxu1 %v1652_v48  ;;  %v1679_v36 = vld [vmem:[#allocation8 + $0x1e0] ss:$12 sps:$4 sm:$0xff]  }
  0x69   :  { %v1696_v48 = vld [vmem:[#allocation8 + $0x22c] ss:$12 sps:$4 sm:$0xff]   ;;  %p1845_p8 = pnand %p1844_p7, %p1838_p4 }
  0x6a   :  { %893 = vmatpush1.bf16.msra.mxu0 %v1613_v28  ;;  %v1673_v28 = vld [vmem:[#allocation8 + $0x1b8] ss:$12 sps:$4 sm:$0xff]  }
  0x6b   :  { %894 = vmatprep.subr.bf16.mxu0 %v1618_v29  ;;  %1487 = vmatpush3.bf16.msra.mxu1 %v1653_v50  ;;  %v1676_v29 = vld [vmem:[#allocation8 + $0x1cc] ss:$12 sps:$4 sm:$0xff]  }
  0x6c   :  { %1488 = vmatprep.subr.bf16.mxu1 %v1657_v52  ;;  %v1698_v52 = vld [vmem:[#allocation8 + $0x230] ss:$12 sps:$4 sm:$0xff]  }
  0x6e   :  { %895 = vmatpush1.bf16.msra.mxu0 %v1616_v32  ;;  %v1678_v32 = vld [vmem:[#allocation8 + $0x1d0] ss:$12 sps:$4 sm:$0xff]  }
  0x6f   :  { %896 = vmatprep.subr.bf16.mxu0 %v1621_v33  ;;  %1489 = vmatpush3.bf16.msra.mxu1 %v1658_v54  ;;  %v1681_v33 = vld [vmem:[#allocation8 + $0x1e4] ss:$12 sps:$4 sm:$0xff]  }
  0x70   :  { %1496 = vmatprep.subr.bf16.mxu1 %v1662_v56  ;;  %v1704_v56 = vld [vmem:[#allocation8 + $0x25c] ss:$12 sps:$4 sm:$0xff]  }
  0x72   :  { %897 = vmatpush1.bf16.msra.mxu0 %v1619_v35  ;;  %v100_v35 = vsub.s32 2, %v1964_v58  ;;  %v1741_v58 = vld [vmem:[#allocation9 + $0x90] sm:$0xff]  }
  0x73   :  { %898 = vmatprep.subr.bf16.mxu0 %v1626_v37  ;;  %v1683_v37 = vld [vmem:[#allocation8 + $0x1e8] ss:$12 sps:$4 sm:$0xff]  }
  0x76   :  { %899 = vmatpush1.bf16.msra.mxu0 %v1624_v38  ;;  %v1686_v38 = vld [vmem:[#allocation8 + $0x1fc] ss:$12 sps:$4 sm:$0xff]  }
  0x77   :  { %900 = vmatprep.subr.bf16.mxu0 %v1631_v39  ;;  %v1687_v39 = vld [vmem:[#allocation8 + $0x2c0] ss:$12 sps:$4 sm:$0xff]  }
  0x7a   :  { %901 = vmatpush1.bf16.msra.mxu0 %v1629_v40  ;;  %v101_v40 = vrot.slane %v1970_v60, %v100_v35  ;;  %v1707_v60 = vld [vmem:[#allocation8 + $0x274] ss:$12 sps:$4 sm:$0xff]  }
  0x7b   :  { %902 = vmatprep.subr.bf16.mxu0 %v1636_v41  ;;  %v1684_v41 = vld [vmem:[#allocation8 + $0x1f8] ss:$12 sps:$4 sm:$0xff]  }
  0x7e   :  { %903 = vmatpush1.bf16.msra.mxu0 %v1634_v42  ;;  %v1688_v42 = vld [vmem:[#allocation8 + $0x200] ss:$12 sps:$4 sm:$0xff]  }
  0x7f   :  { %904 = vmatprep.subr.bf16.mxu0 %v1641_v43  ;;  %v1691_v43 = vld [vmem:[#allocation8 + $0x214] ss:$12 sps:$4 sm:$0xff]  }
  0x82   :  { %905 = vmatpush1.bf16.msra.mxu0 %v1639_v44  ;;  %v1692_v44 = vld [vmem:[#allocation8 + $0x2d8] ss:$12 sps:$4 sm:$0xff]  }
  0x83   :  { %906 = vmatprep.subr.bf16.mxu0 %v1646_v45 }
  0x86   :  { %907 = vmatpush1.bf16.msra.mxu0 %v1644_v46  ;;  %v1689_v46 = vld [vmem:[#allocation8 + $0x210] ss:$12 sps:$4 sm:$0xff]  }
  0x87   :  { %908 = vmatprep.subr.bf16.mxu0 %v1651_v47  ;;  %v1693_v47 = vld [vmem:[#allocation8 + $0x218] ss:$12 sps:$4 sm:$0xff]  }
  0x8a   :  { %909 = vmatpush1.bf16.msra.mxu0 %v1649_v49  ;;  %v1697_v49 = vld [vmem:[#allocation8 + $0x2f0] ss:$12 sps:$4 sm:$0xff]  }
  0x8b   :  { %910 = vmatprep.subr.bf16.mxu0 %v1656_v51  ;;  %v1694_v51 = vld [vmem:[#allocation8 + $0x228] ss:$12 sps:$4 sm:$0xff]  }
  0x8e   :  { %911 = vmatpush1.bf16.msra.mxu0 %v1654_v53  ;;  %v1701_v53 = vld [vmem:[#allocation8 + $0x244] ss:$12 sps:$4 sm:$0xff]  }
  0x8f   :  { %921 = vmatprep.subr.bf16.mxu0 %v1661_v55  ;;  %v1699_v55 = vld [vmem:[#allocation8 + $0x240] ss:$12 sps:$4 sm:$0xff]  }
 0x124   :  { %v168_v1 = vpop.f32.mrb[0].mxu0  ;;  %v1981_v7 = vpop.f32.mrb[0].mxu1 }
 0x125   :  { %v169_v3 = vadd.f32 %v168_v1, %v93_v63  ;;  %v170_v4 = vpop.f32.mrb[1].mxu0  ;;  %v211_v10 = vpop.f32.mrb[1].mxu1  ;;  %v210_v45 = vadd.f32 %v1981_v7, %v101_v40  ;;  %v1710_v63 = vld [vmem:[#allocation8 + $0x28c] ss:$12 sps:$4 sm:$0xff]   ;;  %v1713_v1 = vld [vmem:[#allocation8 + $0x2a4] ss:$12 sps:$4 sm:$0xff]  }
 0x126   :  { %v171_v5 = vadd.f32 %v170_v4, %v97_v0  ;;  %v172_v6 = vpop.f32.mrb[2].mxu0  ;;  %v212_v12 = vadd.f32 %v211_v10, %v105_v2  ;;  %v213_v13 = vpop.f32.mrb[2].mxu1  ;;  %v1708_v0 = vld [vmem:[#allocation8 + $0x288] ss:$12 sps:$4 sm:$0xff]   ;;  %v1711_v2 = vld [vmem:[#allocation8 + $0x2a0] ss:$12 sps:$4 sm:$0xff]  }
 0x127   :  { %v216_v8 = vmax.f32 %v169_v3, 0.0  ;;  %v173_v9 = vpop.f32.mrb[3].mxu0  ;;  %v214_v14 = vpop.f32.mrb[3].mxu1  ;;  %v218_v50 = vmax.f32 %v210_v45, 0.0  ;;  %v1716_v3 = vld [vmem:[#allocation8 + $0x2bc] ss:$12 sps:$4 sm:$0xff]  }
 0x128   :  { %v217_v11 = vmax.f32 %v171_v5, 0.0  ;;  %v219_v18 = vmax.f32 %v212_v12, 0.0  ;;  %v1714_v4 = vld [vmem:[#allocation8 + $0x2b8] ss:$12 sps:$4 sm:$0xff]   ;;  %v1719_v5 = vld [vmem:[#allocation8 + $0x2d4] ss:$12 sps:$4 sm:$0xff]  }
 0x129   :  { %v220_v19 = vpack.c.bf16 %v216_v8, %v216_v8  ;;  %v222_v54 = vpack.c.bf16 %v218_v50, %v218_v50  ;;  %v1717_v6 = vld [vmem:[#allocation8 + $0x2d0] ss:$12 sps:$4 sm:$0xff]   ;;  %v1722_v7 = vld [vmem:[#allocation8 + $0x2ec] ss:$12 sps:$4 sm:$0xff]   ;;  %v1720_v8 = vld [vmem:[#allocation8 + $0x2e8] ss:$12 sps:$4 sm:$0xff]  }
 0x12a   :  { %v221_v15 = vpack.c.bf16 %v217_v11, %v217_v11  ;;  %v223_v22 = vpack.c.bf16 %v219_v18, %v219_v18  ;;  %v1723_v9 = vld [vmem:[#allocation9 + $0x40] sm:$0xff]   ;;  %v1725_v11 = vld [vmem:[#allocation9 + $0x48] sm:$0xff]   ;;  %v1727_v13 = vld [vmem:[#allocation9 + $0x50] sm:$0xff]  }
 0x12b   :  { %v1724_v10 = vld [vmem:[#allocation9] sm:$0xff]   ;;  %v1726_v12 = vld [vmem:[#allocation9 + $0x8] sm:$0xff]   ;;  %v1728_v14 = vld [vmem:[#allocation9 + $0x10] sm:$0xff]  }
 0x12c   :  { %912 = vmatprep.mubr.bf16.mxu0 %v221_v15  ;;  %994 = vmatprep.mubr.bf16.mxu1 %v221_v15  ;;  %v1729_v15 = vld [vmem:[#allocation9 + $0x58] sm:$0xff]   ;;  %v1732_v18 = vld [vmem:[#allocation9 + $0x20] sm:$0xff]  }
 0x12d   :  { %913 = vmatmul.mubr.bf16.vlgmr.msra.gmra.mrb[4].mxu0 %v220_v19  ;;  %995 = vmatmul.mubr.bf16.vlgmr.msra.gmra.mrb[4].mxu1 %v220_v19  ;;  %v1733_v19 = vld [vmem:[#allocation9 + $0x68] sm:$0xff]  }
 0x12e   :  { %922 = vmatpush1.bf16.msra.mxu0 %v1659_v16  ;;  %1497 = vmatpush3.bf16.msra.mxu1 %v1663_v17  ;;  %v1730_v16 = vld [vmem:[#allocation9 + $0x18] sm:$0xff]   ;;  %v1731_v17 = vld [vmem:[#allocation9 + $0x60] sm:$0xff]  }
 0x12f   :  { %923 = vmatprep.subr.bf16.mxu0 %v1666_v20  ;;  %1498 = vmatprep.subr.bf16.mxu1 %v1667_v21  ;;  %v1734_v20 = vld [vmem:[#allocation9 + $0x28] sm:$0xff]   ;;  %v1735_v21 = vld [vmem:[#allocation9 + $0x70] sm:$0xff]  }
 0x130   :  { %1034 = vmatprep.mubr.bf16.mxu1 %v223_v22  ;;  %953 = vmatprep.mubr.bf16.mxu0 %v223_v22  ;;  %v1736_v22 = vld [vmem:[#allocation9 + $0x30] sm:$0xff]  }
 0x132   :  { %924 = vmatpush1.bf16.msra.mxu0 %v1664_v23  ;;  %1499 = vmatpush3.bf16.msra.mxu1 %v1668_v24  ;;  %v1737_v23 = vld [vmem:[#allocation9 + $0x78] sm:$0xff]  }
 0x133   :  { %925 = vmatprep.subr.bf16.mxu0 %v1671_v25  ;;  %1500 = vmatprep.subr.bf16.mxu1 %v1672_v26  ;;  %v1738_v24 = vld [vmem:[#allocation9 + $0x38] sm:$0xff]   ;;  %v1878_v25 = vmov 0.0  }
 0x136   :  { %926 = vmatpush1.bf16.msra.mxu0 %v1669_v27  ;;  %1501 = vmatpush3.bf16.msra.mxu1 %v1673_v28 }
 0x137   :  { %927 = vmatprep.subr.bf16.mxu0 %v1676_v29  ;;  %1502 = vmatprep.subr.bf16.mxu1 %v1677_v30 }
 0x13a   :  { %928 = vmatpush1.bf16.msra.mxu0 %v1674_v31  ;;  %1503 = vmatpush3.bf16.msra.mxu1 %v1678_v32  ;;  %v81_v31 = vld [vmem:[%s2020_s5 + $0x4] sm:$0x7] }
 0x13b   :  { %929 = vmatprep.subr.bf16.mxu0 %v1681_v33  ;;  %1504 = vmatprep.subr.bf16.mxu1 %v1682_v34  ;;  %v364_v32 = vrot.slane %v81_v31, %v100_v35 }
 0x13e   :  { %930 = vmatpush1.bf16.msra.mxu0 %v1679_v36  ;;  %1505 = vmatpush3.bf16.msra.mxu1 %v1683_v37 }
 0x13f   :  { %931 = vmatprep.subr.bf16.mxu0 %v1686_v38  ;;  %1506 = vmatprep.subr.bf16.mxu1 %v1687_v39 }
 0x142   :  { %932 = vmatpush1.bf16.msra.mxu0 %v1684_v41  ;;  %1507 = vmatpush3.bf16.msra.mxu1 %v1688_v42  ;;  %v356_v41 = vrot.slane %v81_v31, %v92_v59  ;;  %v360_v42 = vrot.slane %v81_v31, %v96_v61  ;;  %v1742_v59 = vld [vmem:[#allocation9 + $0x98] sm:$0xff]   ;;  %v1743_v61 = vld [vmem:[#allocation9 + $0xa0] sm:$0xff]  }
 0x143   :  { %933 = vmatprep.subr.bf16.mxu0 %v1691_v43  ;;  %1508 = vmatprep.subr.bf16.mxu1 %v1692_v44 }
 0x146   :  { %934 = vmatpush1.bf16.msra.mxu0 %v1689_v46  ;;  %1509 = vmatpush3.bf16.msra.mxu1 %v1693_v47 }
 0x147   :  { %935 = vmatprep.subr.bf16.mxu0 %v1696_v48  ;;  %1510 = vmatprep.subr.bf16.mxu1 %v1697_v49 }
 0x14a   :  { %936 = vmatpush1.bf16.msra.mxu0 %v1694_v51  ;;  %1511 = vmatpush3.bf16.msra.mxu1 %v1698_v52  ;;  %v1739_v51 = vld [vmem:[#allocation9 + $0x80] sm:$0xff]  }
 0x14b   :  { %937 = vmatprep.subr.bf16.mxu0 %v1701_v53  ;;  %1518 = vmatprep.subr.bf16.mxu1 %v1723_v9  ;;  %v1740_v53 = vld [vmem:[#allocation9 + $0x88] sm:$0xff]  }
 0x14d   :  { %1035 = vmatmul.mubr.bf16.vlgmr.msra.gmra.mrb[8].mxu1 %v222_v54 }
 0x14e   :  { %938 = vmatpush1.bf16.msra.mxu0 %v1699_v55  ;;  %1519 = vmatpush3.bf16.msra.mxu1 %v1724_v10  ;;  %v1745_v55 = vld [vmem:[#allocation9 + $0xb0] sm:$0xff]   ;;  %v1327_v10 = vstv %s2015_s0 }
 0x14f   :  { %939 = vmatprep.subr.bf16.mxu0 %v1704_v56  ;;  %1520 = vmatprep.subr.bf16.mxu1 %v1725_v11  ;;  %v1746_v56 = vld [vmem:[#allocation9 + $0xb8] sm:$0xff]  }
 0x152   :  { %940 = vmatpush1.bf16.msra.mxu0 %v1702_v57  ;;  %1521 = vmatpush3.bf16.msra.mxu1 %v1726_v12 }
 0x153   :  { %941 = vmatprep.subr.bf16.mxu0 %v1707_v60  ;;  %1522 = vmatprep.subr.bf16.mxu1 %v1727_v13 }
 0x156   :  { %942 = vmatpush1.bf16.msra.mxu0 %v1705_v62  ;;  %1523 = vmatpush3.bf16.msra.mxu1 %v1728_v14 }
 0x157   :  { %943 = vmatprep.subr.bf16.mxu0 %v1710_v63  ;;  %1524 = vmatprep.subr.bf16.mxu1 %v1729_v15 }
 0x15a   :  { %944 = vmatpush1.bf16.msra.mxu0 %v1708_v0  ;;  %1525 = vmatpush3.bf16.msra.mxu1 %v1730_v16 }
 0x15b   :  { %945 = vmatprep.subr.bf16.mxu0 %v1713_v1  ;;  %1526 = vmatprep.subr.bf16.mxu1 %v1731_v17 }
 0x15e   :  { %946 = vmatpush1.bf16.msra.mxu0 %v1711_v2  ;;  %1527 = vmatpush3.bf16.msra.mxu1 %v1732_v18 }
 0x15f   :  { %947 = vmatprep.subr.bf16.mxu0 %v1716_v3  ;;  %1528 = vmatprep.subr.bf16.mxu1 %v1733_v19  ;;  %v1449_v3 = vld [vmem:[%s2020_s5 + $0x7] ss:$0 sm:$0xff] }
 0x162   :  { %948 = vmatpush1.bf16.msra.mxu0 %v1714_v4  ;;  %1529 = vmatpush3.bf16.msra.mxu1 %v1734_v20 }
 0x163   :  { %949 = vmatprep.subr.bf16.mxu0 %v1719_v5  ;;  %1530 = vmatprep.subr.bf16.mxu1 %v1735_v21 }
 0x166   :  { %950 = vmatpush1.bf16.msra.mxu0 %v1717_v6  ;;  %1531 = vmatpush3.bf16.msra.mxu1 %v1736_v22 }
 0x167   :  { %951 = vmatprep.subr.bf16.mxu0 %v1722_v7  ;;  %1532 = vmatprep.subr.bf16.mxu1 %v1737_v23 }
 0x16a   :  { %952 = vmatpush1.bf16.msra.mxu0 %v1720_v8  ;;  %1533 = vmatpush3.bf16.msra.mxu1 %v1738_v24 }
 0x16b   :  { %1549 = vmatprep.subr.bf16.mxu1 %v1878_v25 }
 0x16d   :  { %954 = vmatmul.mubr.bf16.vlgmr.msra.gmra.mrb[4].mxu0 %v222_v54  ;;  %v1744_v54 = vld [vmem:[#allocation9 + $0xa8] sm:$0xff]  }
 0x200   :  { %v1490_v26 = vpop.f32.mrb[4].mxu1 }
 0x201   :  { %v1491_v27 = vpop.f32.mrb[5].mxu1 }
 0x202   :  { %v1492_v28 = vadd.f32 %v1491_v27, %v1490_v26  ;;  %v1493_v29 = vpop.f32.mrb[6].mxu1 }
 0x203   :  { %v1494_v30 = vpop.f32.mrb[7].mxu1 }
 0x204   :  { %v997_v36 = vadd.f32 %v1492_v28, %v364_v32 }
 0x220   :  { %v1512_v33 = vpop.f32.mrb[8].mxu1 }
 0x221   :  { %v1513_v34 = vpop.f32.mrb[9].mxu1 }
 0x222   :  { %v1514_v37 = vadd.f32 %v1513_v34, %v1512_v33  ;;  %v1515_v38 = vpop.f32.mrb[10].mxu1 }
 0x223   :  { %v1516_v39 = vpop.f32.mrb[11].mxu1 }
 0x224   :  { %v1037_v40 = vadd.f32 %v1514_v37, %v997_v36 }
 0x226   :  { %v1044_v57 = vmax.f32 %v1037_v40, 0.0 }
 0x228   :  { %v1047_v60 = vpack.c.bf16 %v1044_v57, %v1044_v57 }
 0x240   :  { %v955_v43 = vpop.f32.mrb[4].mxu0 }
 0x241   :  { %v1569_v44 = vadd.f32 %v955_v43, %v356_v41  ;;  %v957_v45 = vpop.f32.mrb[5].mxu0 }
 0x242   :  { %v1570_v46 = vadd.f32 %v957_v45, %v360_v42  ;;  %v959_v47 = vpop.f32.mrb[6].mxu0 }
 0x243   :  { %v1042_v48 = vmax.f32 %v1569_v44, 0.0  ;;  %v960_v35 = vpop.f32.mrb[7].mxu0 }
 0x244   :  { %v1043_v49 = vmax.f32 %v1570_v46, 0.0 }
 0x245   :  { %v1045_v52 = vpack.c.bf16 %v1042_v48, %v1042_v48 }
 0x246   :  { %v1046_v50 = vpack.c.bf16 %v1043_v49, %v1043_v49 }
 0x248   :  { %1278 = vmatprep.mubr.bf16.mxu1 %v1046_v50 }
 0x249   :  { %1279 = vmatmul.mubr.bf16.vlgmr.msra.gmra.mrb[12].mxu1 %v1045_v52 }
 0x24a   :  { %1550 = vmatpush3.bf16.msra.mxu1 %v1739_v51  ;;  %1565 = vmatprep.mubr.msk.bf16.mxu1 %vm1879_vm1, %v1878_v25 }
 0x24b   :  { %1551 = vmatprep.subr.bf16.mxu1 %v1878_v25 }
 0x24e   :  { %1552 = vmatpush3.bf16.msra.mxu1 %v1740_v53 }
 0x24f   :  { %1553 = vmatprep.subr.bf16.mxu1 %v1878_v25 }
 0x252   :  { %1554 = vmatpush3.bf16.msra.mxu1 %v1741_v58 }
 0x253   :  { %1555 = vmatprep.subr.bf16.mxu1 %v1878_v25 }
 0x256   :  { %1556 = vmatpush3.bf16.msra.mxu1 %v1742_v59 }
 0x257   :  { %1557 = vmatprep.subr.bf16.mxu1 %v1878_v25 }
 0x25a   :  { %1558 = vmatpush3.bf16.msra.mxu1 %v1743_v61 }
 0x25b   :  { %1559 = vmatprep.subr.bf16.mxu1 %v1878_v25 }
 0x25e   :  { %1560 = vmatpush3.bf16.msra.mxu1 %v1744_v54 }
 0x25f   :  { %1561 = vmatprep.subr.bf16.mxu1 %v1878_v25 }
 0x262   :  { %1562 = vmatpush3.bf16.msra.mxu1 %v1745_v55 }
 0x263   :  { %1563 = vmatprep.subr.bf16.mxu1 %v1878_v25 }
 0x266   :  { %1564 = vmatpush3.bf16.msra.mxu1 %v1746_v56 }
 0x269   :  { %1566 = vmatmul.mubr.bf16.vlgmr.msra.gmra.mrb[16].mxu1 %v1047_v60 }
 0x31c   :  { %v1534_v62 = vpop.f32.mrb[12].mxu1 }
 0x31d   :  { %v1535_v63 = vpop.f32.mrb[13].mxu1 }
 0x31e   :  { %v1536_v0 = vadd.f32 %v1535_v63, %v1534_v62  ;;  %v1537_v1 = vpop.f32.mrb[14].mxu1 }
 0x31f   :  { %v1538_v2 = vpop.f32.mrb[15].mxu1 }
 0x320   :  { %v1281_v4 = vadd.f32 %v1536_v0, %v1449_v3 }
 0x33c   :  { %v1320_v5 = vpop.f32.mrb[16].mxu1 }
 0x33d   :  { %v1321_v6 = vadd.f32 %v1320_v5, %v1281_v4  ;;  %v1567_v7 = vpop.f32.mrb[17].mxu1 }
 0x33e   :  { %v1323_v8 = vpop.f32.mrb[18].mxu1 }
 0x33f   :  { %1747 = vtanh.f32 %v1321_v6  ;;  %v1568_v9 = vpop.f32.mrb[19].mxu1 }
 0x349   :  { %v1748_v11 = vpop.eup %1747 }
 0x34a   :  { %v1328_v12 = vmul.f32 %v1748_v11, %v1327_v10 }
 0x34c   :  { %1329 = vst [vmem:[#allocation11] sm:$0xff] %v1328_v12 }
 0x34d   :  { %1848 = shalt.err (!%p1845_p8)
}
 0x34e   :  { %s1849_s9 = scalar_lea.hbm %s2021_s6, 128 }
 0x34f   :  { %p1850_p9 = scmp.ne.s32.totalorder %s2021_s6, %s1849_s9  ;;  %p1853_p10 = scmp.lt.u32.totalorder %s1849_s9, %s2021_s6 }
 0x351   :  { %p1855_p11 = pnand %p1853_p10, %p1850_p9 }
 0x353   :  { %1858 = shalt.err (!%p1855_p11)
}
 0x354   :  { %1339 = dma.vmem_to_hbm [thread:$0]  %s1337_s7, 128, %s2021_s6, [#allocation5]  }
 0x355   :  { %1865 = dma.done.wait [#allocation5], 128  }
 0x356   :  { %1866 = vsyncadd [#allocation5], 4294967168 }
 0x357   :  { %1343 = vsyncpa [#allocation4], 1 }
 0x358   :  { %1344 = vsyncpa [#allocation7], 1 }
 0x359   :  { %1345 = vsyncpa [#allocation10], 1 }
 0x35a   :  { %1346 = vsyncpa [#allocation5], 1 }

// kernel: tpu_custom_call.1
= control target key start
LH: loop header
LB: loop body
LE: loop exit
PB: predicated region body
PF: predicated region fallthrough
CT: control target
= control target key end

     0   :  { %12 = vsyncpa [#allocation4], 0  ;;  %s2015_s0 = inlined_call_operand.<no memory space> [shape: f32[1,1], index: 0, kind: input, shape index: {}]   ;;  %s2016_s1 = inlined_call_operand.hbm [shape: f32[8,16], index: 1, kind: input, shape index: {}]   ;;  %s2017_s2 = inlined_call_operand.hbm [shape: bf16[16,512], index: 2, kind: input, shape index: {}]   ;;  %s2018_s3 = inlined_call_operand.hbm [shape: bf16[512,384], index: 3, kind: input, shape index: {}]   ;;  %s2019_s4 = inlined_call_operand.hbm [shape: bf16[384,128], index: 4, kind: input, shape index: {}]   ;;  %s2020_s5 = inlined_call_operand.vmem [shape: f32[1,1024], index: 5, kind: input, shape index: {}]   ;;  %s2021_s6 = inlined_call_operand.hbm [shape: f32[8,128], index: 6, kind: output, shape index: {}]  }
   0x1   :  { %13 = vsyncpa [#allocation7], 0 }
   0x2   :  { %14 = vsyncpa [#allocation10], 0 }
   0x3   :  { %15 = vsyncpa [#allocation5], 0  ;;  %s1867_s21 = smov [#allocation6]   ;;  %s1749_s25 = scalar_lea.hbm %s2017_s2, 512 }
   0x4   :  { %s33_s22 = sshll.u32 %s1867_s21, 4  ;;  %p1750_p0 = scmp.ne.s32.totalorder %s2017_s2, %s1749_s25  ;;  %s34_s22 = int_to_ptr.vmem [resolvable:$true] %s33_s22 }
   0x5   :  { %p1753_p1 = scmp.lt.u32.totalorder %s1749_s25, %s2017_s2 }
   0x7   :  { %p1755_p2 = pnand %p1753_p1, %p1750_p0 }
   0x9   :  { %1758 = shalt.err (!%p1755_p2)
}
   0xa   :  { %s1759_s30 = scalar_lea.vmem %s34_s22, 512  ;;  %p1764_p4 = scmp.lt.s32.totalorder %s34_s22, %s34_s22 }
   0xb   :  { %p1760_p3 = scmp.ne.s32.totalorder %s34_s22, %s1759_s30  ;;  %p1765_p5 = scmp.lt.s32.totalorder %s1759_s30, %s1759_s30 }
   0xd   :  { %p1766_p6 = por %p1765_p5, %p1764_p4 }
   0xf   :  { %p1767_p7 = pnand %p1766_p6, %p1760_p3 }
  0x11   :  { %1770 = shalt.err (!%p1767_p7)
}
  0x12   :  { %s1868_s7 = smov 256   ;;  %s1869_s8 = smov 16  }
  0x13   :  { %39 = dma.hbm_to_vmem [thread:$0]  %s2017_s2, 512, %s34_s22, [#allocation7], %s1868_s7, %s1868_s7, %s1869_s8  }
  0x14   :  { %s1870_s11 = smov [#allocation3]   ;;  %s1871_s13 = smov [#allocation8]  }
  0x15   :  { %s24_s12 = sshll.u32 %s1870_s11, 4  ;;  %s45_s14 = sshll.u32 %s1871_s13, 4  ;;  %s25_s12 = int_to_ptr.vmem [resolvable:$true] %s24_s12  ;;  %s46_s14 = int_to_ptr.vmem [resolvable:$true] %s45_s14 }
  0x16   :  { %s1771_s17 = scalar_lea.hbm %s2016_s1, 128 }
  0x17   :  { %p1772_p8 = scmp.ne.s32.totalorder %s2016_s1, %s1771_s17  ;;  %p1775_p9 = scmp.lt.u32.totalorder %s1771_s17, %s2016_s1 }
  0x19   :  { %p1777_p10 = pnand %p1775_p9, %p1772_p8 }
  0x1b   :  { %1780 = shalt.err (!%p1777_p10)
}
  0x1c   :  { %s1781_s2 = scalar_lea.vmem %s25_s12, 128  ;;  %p1786_p12 = scmp.lt.s32.totalorder %s25_s12, %s25_s12 }
  0x1d   :  { %p1782_p11 = scmp.ne.s32.totalorder %s25_s12, %s1781_s2  ;;  %p1787_p13 = scmp.lt.s32.totalorder %s1781_s2, %s1781_s2 }
  0x1f   :  { %p1788_p0 = por %p1787_p13, %p1786_p12 }
  0x21   :  { %p1789_p1 = pnand %p1788_p0, %p1782_p11 }
  0x23   :  { %1792 = shalt.err (!%p1789_p1)
}
  0x24   :  { %27 = dma.hbm_to_vmem [thread:$0]  %s2016_s1, 128, %s25_s12, [#allocation4]  }
  0x25   :  { %s1793_s26 = scalar_lea.hbm %s2018_s3, 12288 }
  0x26   :  { %p1794_p2 = scmp.ne.s32.totalorder %s2018_s3, %s1793_s26  ;;  %p1797_p3 = scmp.lt.u32.totalorder %s1793_s26, %s2018_s3 }
  0x28   :  { %p1799_p4 = pnand %p1797_p3, %p1794_p2 }
  0x2a   :  { %1802 = shalt.err (!%p1799_p4)
}
  0x2b   :  { %s1803_s7 = scalar_lea.vmem %s46_s14, 12288  ;;  %p1808_p6 = scmp.lt.s32.totalorder %s46_s14, %s46_s14 }
  0x2c   :  { %p1804_p5 = scmp.ne.s32.totalorder %s46_s14, %s1803_s7  ;;  %p1809_p7 = scmp.lt.s32.totalorder %s1803_s7, %s1803_s7 }
  0x2e   :  { %p1810_p8 = por %p1809_p7, %p1808_p6 }
  0x30   :  { %p1811_p9 = pnand %p1810_p8, %p1804_p5 }
  0x32   :  { %1814 = shalt.err (!%p1811_p9)
}
  0x33   :  { %s1872_s1 = smov 192   ;;  %s1873_s8 = smov 12  }
  0x34   :  { %51 = dma.hbm_to_vmem [thread:$0]  %s2018_s3, 12288, %s46_s14, [#allocation7], %s1872_s1, %s1872_s1, %s1873_s8  }
  0x35   :  { %s1874_s11 = smov [#allocation9]   ;;  %s1815_s16 = scalar_lea.hbm %s2019_s4, 3072 }
  0x36   :  { %s57_s12 = sshll.u32 %s1874_s11, 4  ;;  %p1816_p10 = scmp.ne.s32.totalorder %s2019_s4, %s1815_s16  ;;  %s58_s12 = int_to_ptr.vmem [resolvable:$true] %s57_s12 }
  0x37   :  { %p1819_p11 = scmp.lt.u32.totalorder %s1815_s16, %s2019_s4 }
  0x39   :  { %p1821_p12 = pnand %p1819_p11, %p1816_p10 }
  0x3b   :  { %1824 = shalt.err (!%p1821_p12)
}
  0x3c   :  { %s1825_s21 = scalar_lea.vmem %s58_s12, 3072  ;;  %p1830_p0 = scmp.lt.s32.totalorder %s58_s12, %s58_s12 }
  0x3d   :  { %p1826_p13 = scmp.ne.s32.totalorder %s58_s12, %s1825_s21  ;;  %p1831_p1 = scmp.lt.s32.totalorder %s1825_s21, %s1825_s21 }
  0x3f   :  { %p1832_p2 = por %p1831_p1, %p1830_p0 }
  0x41   :  { %p1833_p3 = pnand %p1832_p2, %p1826_p13 }
  0x43   :  { %1836 = shalt.err (!%p1833_p3)
}
  0x44   :  { %s1875_s3 = smov 64   ;;  %s1876_s14 = smov 4  }
  0x45   :  { %63 = dma.hbm_to_vmem [thread:$0]  %s2019_s4, 3072, %s58_s12, [#allocation10], %s1875_s3, %s1875_s3, %s1876_s14  }
  0x46   :  { %1859 = dma.done.wait [#allocation4], 128  }
  0x47   :  { %1860 = vsyncadd [#allocation4], 4294967168 }
  0x48   :  { %1861 = dma.done.wait [#allocation7], 12800  }
  0x49   :  { %1862 = vsyncadd [#allocation7], 4294954496 }
  0x4a   :  { %1863 = dma.done.wait [#allocation10], 3072  }
  0x4b   :  { %1864 = vsyncadd [#allocation10], 4294964224  ;;  %v1877_v0 = vmov 0   ;;  %v1589_v1 = vld [vmem:[#allocation6 + $0x4] ss:$16 sps:$4 sm:$0xff]   ;;  %v83_v3 = vld [vmem:[#allocation3] sm:$0xff]  ;;  %v90_v57 = vlaneseq }
  0x4c   :  { %166 = vmatprep.mubr.bf16.mxu0 %v1877_v0  ;;  %207 = vmatprep.mubr.bf16.mxu1 %v1877_v0  ;;  %v1591_v2 = vld [vmem:[#allocation6] ss:$16 sps:$4 sm:$0xff]   ;;  %v84_v4 = vpack.c.bf16 %v83_v3, %v83_v3  ;;  %v1592_v5 = vld [vmem:[#allocation6 + $0xc] ss:$16 sps:$4 sm:$0xff]   ;;  %v1594_v6 = vld [vmem:[#allocation6 + $0x8] ss:$16 sps:$4 sm:$0xff]  }
  0x4d   :  { %134 = vmatprep.subr.bf16.mxu0 %v1589_v1  ;;  %vm130_vm0 = vcmask 130048   ;;  %v1595_v7 = vld [vmem:[#allocation8] ss:$12 sps:$4 sm:$0xff]   ;;  %175 = vmatprep.subr.bf16.mxu1 %v1592_v5  ;;  %v1597_v8 = vld [vmem:[#allocation8 + $0x4] ss:$12 sps:$4 sm:$0xff]   ;;  %v1964_v58 = vshrl.u32 %v90_v57, 7 }
  0x4e   :  { %135 = vmatpush1.bf16.msra.mxu0 %v1591_v2  ;;  %176 = vmatpush1.bf16.msra.mxu1 %v1594_v6  ;;  %v1600_v9 = vld [vmem:[#allocation8 + $0x1c] ss:$12 sps:$4 sm:$0xff]   ;;  %v1598_v10 = vld [vmem:[#allocation8 + $0x18] ss:$12 sps:$4 sm:$0xff]   ;;  %v1603_v11 = vld [vmem:[#allocation8 + $0x34] ss:$12 sps:$4 sm:$0xff]  }
  0x4f   :  { %880 = vmatprep.subr.bf16.mxu0 %v1597_v8  ;;  %v1601_v12 = vld [vmem:[#allocation8 + $0x30] ss:$12 sps:$4 sm:$0xff]   ;;  %v1606_v13 = vld [vmem:[#allocation8 + $0x4c] ss:$12 sps:$4 sm:$0xff]   ;;  %v1604_v14 = vld [vmem:[#allocation8 + $0x48] ss:$12 sps:$4 sm:$0xff]  }
  0x50   :  { %v1609_v15 = vld [vmem:[#allocation8 + $0x64] ss:$12 sps:$4 sm:$0xff]   ;;  %v1622_v16 = vld [vmem:[#allocation8 + $0xc8] ss:$12 sps:$4 sm:$0xff]   ;;  %v1607_v18 = vld [vmem:[#allocation8 + $0x60] ss:$12 sps:$4 sm:$0xff]  }
  0x51   :  { %1351 = vmatmul.mubr.msk.bf16.vlgmr.msra.gmra.mrb[0].mxu0 %vm130_vm0, %v84_v4  ;;  %1352 = vmatmul.mubr.msk.bf16.vlgmr.msra.gmra.mrb[0].mxu1 %vm130_vm0, %v84_v4  ;;  %v1623_v17 = vld [vmem:[#allocation8 + $0x8] ss:$12 sps:$4 sm:$0xff]   ;;  %v1627_v20 = vld [vmem:[#allocation8 + $0xe0] ss:$12 sps:$4 sm:$0xff]   ;;  %v1610_v22 = vld [vmem:[#allocation8 + $0x78] ss:$12 sps:$4 sm:$0xff]  }
  0x52   :  { %881 = vmatpush1.bf16.msra.mxu0 %v1595_v7  ;;  %1474 = vmatprep.subr.bf16.mxu1 %v1622_v16  ;;  %v1612_v19 = vld [vmem:[#allocation8 + $0x7c] ss:$12 sps:$4 sm:$0xff]   ;;  %v1628_v21 = vld [vmem:[#allocation8 + $0x20] ss:$12 sps:$4 sm:$0xff]   ;;  %v1632_v23 = vld [vmem:[#allocation8 + $0xf8] ss:$12 sps:$4 sm:$0xff]  }
  0x53   :  { %882 = vmatprep.subr.bf16.mxu0 %v1600_v9  ;;  %1475 = vmatpush3.bf16.msra.mxu1 %v1623_v17  ;;  %v1633_v24 = vld [vmem:[#allocation8 + $0x38] ss:$12 sps:$4 sm:$0xff]   ;;  %v1615_v25 = vld [vmem:[#allocation8 + $0x94] ss:$12 sps:$4 sm:$0xff]   ;;  %v1637_v26 = vld [vmem:[#allocation8 + $0x110] ss:$12 sps:$4 sm:$0xff]  }
  0x54   :  { %1476 = vmatprep.subr.bf16.mxu1 %v1627_v20  ;;  %v1638_v27 = vld [vmem:[#allocation8 + $0x50] ss:$12 sps:$4 sm:$0xff]   ;;  %v1618_v29 = vld [vmem:[#allocation8 + $0xac] ss:$12 sps:$4 sm:$0xff]   ;;  %v1642_v30 = vld [vmem:[#allocation8 + $0x128] ss:$12 sps:$4 sm:$0xff]  }
  0x55   :  { %v1613_v28 = vld [vmem:[#allocation8 + $0x90] ss:$12 sps:$4 sm:$0xff]   ;;  %v1643_v31 = vld [vmem:[#allocation8 + $0x68] ss:$12 sps:$4 sm:$0xff]   ;;  %v1647_v34 = vld [vmem:[#allocation8 + $0x140] ss:$12 sps:$4 sm:$0xff]  }
  0x56   :  { %883 = vmatpush1.bf16.msra.mxu0 %v1598_v10  ;;  %v1616_v32 = vld [vmem:[#allocation8 + $0xa8] ss:$12 sps:$4 sm:$0xff]   ;;  %v1621_v33 = vld [vmem:[#allocation8 + $0xc4] ss:$12 sps:$4 sm:$0xff]   ;;  %v1619_v35 = vld [vmem:[#allocation8 + $0xc0] ss:$12 sps:$4 sm:$0xff]  }
  0x57   :  { %884 = vmatprep.subr.bf16.mxu0 %v1603_v11  ;;  %1477 = vmatpush3.bf16.msra.mxu1 %v1628_v21  ;;  %v1648_v36 = vld [vmem:[#allocation8 + $0x80] ss:$12 sps:$4 sm:$0xff]   ;;  %v1626_v37 = vld [vmem:[#allocation8 + $0xdc] ss:$12 sps:$4 sm:$0xff]   ;;  %v1624_v38 = vld [vmem:[#allocation8 + $0xd8] ss:$12 sps:$4 sm:$0xff]  }
  0x58   :  { %1478 = vmatprep.subr.bf16.mxu1 %v1632_v23  ;;  %v1631_v39 = vld [vmem:[#allocation8 + $0xf4] ss:$12 sps:$4 sm:$0xff]   ;;  %v1629_v40 = vld [vmem:[#allocation8 + $0xf0] ss:$12 sps:$4 sm:$0xff]   ;;  %v1636_v41 = vld [vmem:[#allocation8 + $0x10c] ss:$12 sps:$4 sm:$0xff]  }
  0x59   :  { %v1634_v42 = vld [vmem:[#allocation8 + $0x108] ss:$12 sps:$4 sm:$0xff]   ;;  %v1641_v43 = vld [vmem:[#allocation8 + $0x124] ss:$12 sps:$4 sm:$0xff]   ;;  %v1639_v44 = vld [vmem:[#allocation8 + $0x120] ss:$12 sps:$4 sm:$0xff]  }
  0x5a   :  { %885 = vmatpush1.bf16.msra.mxu0 %v1601_v12  ;;  %v1646_v45 = vld [vmem:[#allocation8 + $0x13c] ss:$12 sps:$4 sm:$0xff]   ;;  %v1644_v46 = vld [vmem:[#allocation8 + $0x138] ss:$12 sps:$4 sm:$0xff]   ;;  %v1651_v47 = vld [vmem:[#allocation8 + $0x154] ss:$12 sps:$4 sm:$0xff]  }
  0x5b   :  { %886 = vmatprep.subr.bf16.mxu0 %v1606_v13  ;;  %1479 = vmatpush3.bf16.msra.mxu1 %v1633_v24  ;;  %v1652_v48 = vld [vmem:[#allocation8 + $0x158] ss:$12 sps:$4 sm:$0xff]   ;;  %v1649_v49 = vld [vmem:[#allocation8 + $0x150] ss:$12 sps:$4 sm:$0xff]   ;;  %v1654_v53 = vld [vmem:[#allocation8 + $0x168] ss:$12 sps:$4 sm:$0xff]  }
  0x5c   :  { %1480 = vmatprep.subr.bf16.mxu1 %v1637_v26  ;;  %v1653_v50 = vld [vmem:[#allocation8 + $0x98] ss:$12 sps:$4 sm:$0xff]   ;;  %v1657_v52 = vld [vmem:[#allocation8 + $0x170] ss:$12 sps:$4 sm:$0xff]   ;;  %v1662_v56 = vld [vmem:[#allocation8 + $0x248] ss:$12 sps:$4 sm:$0xff]  }
  0x5d   :  { %v1656_v51 = vld [vmem:[#allocation8 + $0x16c] ss:$12 sps:$4 sm:$0xff]   ;;  %v1658_v54 = vld [vmem:[#allocation8 + $0xb0] ss:$12 sps:$4 sm:$0xff]   ;;  %v92_v59 = vsub.s32 0, %v1964_v58  ;;  %v96_v61 = vsub.s32 1, %v1964_v58 }
  0x5e   :  { %887 = vmatpush1.bf16.msra.mxu0 %v1604_v14  ;;  %v1661_v55 = vld [vmem:[#allocation8 + $0x184] ss:$12 sps:$4 sm:$0xff]   ;;  %v1970_v60 = vld [vmem:[%s2020_s5] sm:$0xf]  ;;  %v104_v62 = vsub.s32 3, %v1964_v58  ;;  %vm1879_vm1 = vmmov 0  }
  0x5f   :  { %888 = vmatprep.subr.bf16.mxu0 %v1609_v15  ;;  %1481 = vmatpush3.bf16.msra.mxu1 %v1638_v27  ;;  %v93_v63 = vrot.slane %v1970_v60, %v92_v59  ;;  %v97_v0 = vrot.slane %v1970_v60, %v96_v61  ;;  %v1659_v16 = vld [vmem:[#allocation8 + $0x180] ss:$12 sps:$4 sm:$0xff]   ;;  %v1663_v17 = vld [vmem:[#allocation8 + $0x188] ss:$12 sps:$4 sm:$0xff]   ;;  %v1664_v23 = vld [vmem:[#allocation8 + $0x198] ss:$12 sps:$4 sm:$0xff]  }
  0x60   :  { %1482 = vmatprep.subr.bf16.mxu1 %v1642_v30  ;;  %v105_v2 = vrot.slane %v1970_v60, %v104_v62  ;;  %v1666_v20 = vld [vmem:[#allocation8 + $0x19c] ss:$12 sps:$4 sm:$0xff]   ;;  %v1667_v21 = vld [vmem:[#allocation8 + $0x260] ss:$12 sps:$4 sm:$0xff]   ;;  %v1672_v26 = vld [vmem:[#allocation8 + $0x278] ss:$12 sps:$4 sm:$0xff]  }
  0x61   :  { %v1668_v24 = vld [vmem:[#allocation8 + $0x1a0] ss:$12 sps:$4 sm:$0xff]   ;;  %v1669_v27 = vld [vmem:[#allocation8 + $0x1b0] ss:$12 sps:$4 sm:$0xff]   ;;  %v1702_v57 = vld [vmem:[#allocation8 + $0x258] ss:$12 sps:$4 sm:$0xff]  }
  0x62   :  { %889 = vmatpush1.bf16.msra.mxu0 %v1607_v18  ;;  %v1677_v30 = vld [vmem:[#allocation8 + $0x290] ss:$12 sps:$4 sm:$0xff]   ;;  %s1880_s30 = smov [#allocation11]  }
  0x63   :  { %890 = vmatprep.subr.bf16.mxu0 %v1612_v19  ;;  %1483 = vmatpush3.bf16.msra.mxu1 %v1643_v31  ;;  %v1674_v31 = vld [vmem:[#allocation8 + $0x1c8] ss:$12 sps:$4 sm:$0xff]   ;;  %v1705_v62 = vld [vmem:[#allocation8 + $0x270] ss:$12 sps:$4 sm:$0xff]   ;;  %s1336_s7 = sshll.u32 %s1880_s30, 4  ;;  %s1337_s7 = int_to_ptr.vmem [resolvable:$true] %s1336_s7 }
  0x64   :  { %1484 = vmatprep.subr.bf16.mxu1 %v1647_v34  ;;  %v1682_v34 = vld [vmem:[#allocation8 + $0x2a8] ss:$12 sps:$4 sm:$0xff]   ;;  %s1837_s1 = scalar_lea.vmem %s1337_s7, 128  ;;  %p1842_p5 = scmp.lt.s32.totalorder %s1337_s7, %s1337_s7 }
  0x65   :  { %p1838_p4 = scmp.ne.s32.totalorder %s1337_s7, %s1837_s1  ;;  %p1843_p6 = scmp.lt.s32.totalorder %s1837_s1, %s1837_s1 }
  0x66   :  { %891 = vmatpush1.bf16.msra.mxu0 %v1610_v22 }
  0x67   :  { %892 = vmatprep.subr.bf16.mxu0 %v1615_v25  ;;  %1485 = vmatpush3.bf16.msra.mxu1 %v1648_v36  ;;  %v1671_v25 = vld [vmem:[#allocation8 + $0x1b4] ss:$12 sps:$4 sm:$0xff]   ;;  %p1844_p7 = por %p1843_p6, %p1842_p5 }
  0x68   :  { %1486 = vmatprep.subr.bf16.mxu1 %v1652_v48  ;;  %v1679_v36 = vld [vmem:[#allocation8 + $0x1e0] ss:$12 sps:$4 sm:$0xff]  }
  0x69   :  { %v1696_v48 = vld [vmem:[#allocation8 + $0x22c] ss:$12 sps:$4 sm:$0xff]   ;;  %p1845_p8 = pnand %p1844_p7, %p1838_p4 }
  0x6a   :  { %893 = vmatpush1.bf16.msra.mxu0 %v1613_v28  ;;  %v1673_v28 = vld [vmem:[#allocation8 + $0x1b8] ss:$12 sps:$4 sm:$0xff]  }
  0x6b   :  { %894 = vmatprep.subr.bf16.mxu0 %v1618_v29  ;;  %1487 = vmatpush3.bf16.msra.mxu1 %v1653_v50  ;;  %v1676_v29 = vld [vmem:[#allocation8 + $0x1cc] ss:$12 sps:$4 sm:$0xff]  }
  0x6c   :  { %1488 = vmatprep.subr.bf16.mxu1 %v1657_v52  ;;  %v1698_v52 = vld [vmem:[#allocation8 + $0x230] ss:$12 sps:$4 sm:$0xff]  }
  0x6e   :  { %895 = vmatpush1.bf16.msra.mxu0 %v1616_v32  ;;  %v1678_v32 = vld [vmem:[#allocation8 + $0x1d0] ss:$12 sps:$4 sm:$0xff]  }
  0x6f   :  { %896 = vmatprep.subr.bf16.mxu0 %v1621_v33  ;;  %1489 = vmatpush3.bf16.msra.mxu1 %v1658_v54  ;;  %v1681_v33 = vld [vmem:[#allocation8 + $0x1e4] ss:$12 sps:$4 sm:$0xff]  }
  0x70   :  { %1496 = vmatprep.subr.bf16.mxu1 %v1662_v56  ;;  %v1704_v56 = vld [vmem:[#allocation8 + $0x25c] ss:$12 sps:$4 sm:$0xff]  }
  0x72   :  { %897 = vmatpush1.bf16.msra.mxu0 %v1619_v35  ;;  %v100_v35 = vsub.s32 2, %v1964_v58  ;;  %v1741_v58 = vld [vmem:[#allocation9 + $0x90] sm:$0xff]  }
  0x73   :  { %898 = vmatprep.subr.bf16.mxu0 %v1626_v37  ;;  %v1683_v37 = vld [vmem:[#allocation8 + $0x1e8] ss:$12 sps:$4 sm:$0xff]  }
  0x76   :  { %899 = vmatpush1.bf16.msra.mxu0 %v1624_v38  ;;  %v1686_v38 = vld [vmem:[#allocation8 + $0x1fc] ss:$12 sps:$4 sm:$0xff]  }
  0x77   :  { %900 = vmatprep.subr.bf16.mxu0 %v1631_v39  ;;  %v1687_v39 = vld [vmem:[#allocation8 + $0x2c0] ss:$12 sps:$4 sm:$0xff]  }
  0x7a   :  { %901 = vmatpush1.bf16.msra.mxu0 %v1629_v40  ;;  %v101_v40 = vrot.slane %v1970_v60, %v100_v35  ;;  %v1707_v60 = vld [vmem:[#allocation8 + $0x274] ss:$12 sps:$4 sm:$0xff]  }
  0x7b   :  { %902 = vmatprep.subr.bf16.mxu0 %v1636_v41  ;;  %v1684_v41 = vld [vmem:[#allocation8 + $0x1f8] ss:$12 sps:$4 sm:$0xff]  }
  0x7e   :  { %903 = vmatpush1.bf16.msra.mxu0 %v1634_v42  ;;  %v1688_v42 = vld [vmem:[#allocation8 + $0x200] ss:$12 sps:$4 sm:$0xff]  }
  0x7f   :  { %904 = vmatprep.subr.bf16.mxu0 %v1641_v43  ;;  %v1691_v43 = vld [vmem:[#allocation8 + $0x214] ss:$12 sps:$4 sm:$0xff]  }
  0x82   :  { %905 = vmatpush1.bf16.msra.mxu0 %v1639_v44  ;;  %v1692_v44 = vld [vmem:[#allocation8 + $0x2d8] ss:$12 sps:$4 sm:$0xff]  }
  0x83   :  { %906 = vmatprep.subr.bf16.mxu0 %v1646_v45 }
  0x86   :  { %907 = vmatpush1.bf16.msra.mxu0 %v1644_v46  ;;  %v1689_v46 = vld [vmem:[#allocation8 + $0x210] ss:$12 sps:$4 sm:$0xff]  }
  0x87   :  { %908 = vmatprep.subr.bf16.mxu0 %v1651_v47  ;;  %v1693_v47 = vld [vmem:[#allocation8 + $0x218] ss:$12 sps:$4 sm:$0xff]  }
  0x8a   :  { %909 = vmatpush1.bf16.msra.mxu0 %v1649_v49  ;;  %v1697_v49 = vld [vmem:[#allocation8 + $0x2f0] ss:$12 sps:$4 sm:$0xff]  }
  0x8b   :  { %910 = vmatprep.subr.bf16.mxu0 %v1656_v51  ;;  %v1694_v51 = vld [vmem:[#allocation8 + $0x228] ss:$12 sps:$4 sm:$0xff]  }
  0x8e   :  { %911 = vmatpush1.bf16.msra.mxu0 %v1654_v53  ;;  %v1701_v53 = vld [vmem:[#allocation8 + $0x244] ss:$12 sps:$4 sm:$0xff]  }
  0x8f   :  { %921 = vmatprep.subr.bf16.mxu0 %v1661_v55  ;;  %v1699_v55 = vld [vmem:[#allocation8 + $0x240] ss:$12 sps:$4 sm:$0xff]  }
 0x124   :  { %v168_v1 = vpop.f32.mrb[0].mxu0  ;;  %v1981_v7 = vpop.f32.mrb[0].mxu1 }
 0x125   :  { %v169_v3 = vadd.f32 %v168_v1, %v93_v63  ;;  %v170_v4 = vpop.f32.mrb[1].mxu0  ;;  %v211_v10 = vpop.f32.mrb[1].mxu1  ;;  %v210_v45 = vadd.f32 %v1981_v7, %v101_v40  ;;  %v1710_v63 = vld [vmem:[#allocation8 + $0x28c] ss:$12 sps:$4 sm:$0xff]   ;;  %v1713_v1 = vld [vmem:[#allocation8 + $0x2a4] ss:$12 sps:$4 sm:$0xff]  }
 0x126   :  { %v171_v5 = vadd.f32 %v170_v4, %v97_v0  ;;  %v172_v6 = vpop.f32.mrb[2].mxu0  ;;  %v212_v12 = vadd.f32 %v211_v10, %v105_v2  ;;  %v213_v13 = vpop.f32.mrb[2].mxu1  ;;  %v1708_v0 = vld [vmem:[#allocation8 + $0x288] ss:$12 sps:$4 sm:$0xff]   ;;  %v1711_v2 = vld [vmem:[#allocation8 + $0x2a0] ss:$12 sps:$4 sm:$0xff]  }
 0x127   :  { %v216_v8 = vmax.f32 %v169_v3, 0.0  ;;  %v173_v9 = vpop.f32.mrb[3].mxu0  ;;  %v214_v14 = vpop.f32.mrb[3].mxu1  ;;  %v218_v50 = vmax.f32 %v210_v45, 0.0  ;;  %v1716_v3 = vld [vmem:[#allocation8 + $0x2bc] ss:$12 sps:$4 sm:$0xff]  }
 0x128   :  { %v217_v11 = vmax.f32 %v171_v5, 0.0  ;;  %v219_v18 = vmax.f32 %v212_v12, 0.0  ;;  %v1714_v4 = vld [vmem:[#allocation8 + $0x2b8] ss:$12 sps:$4 sm:$0xff]   ;;  %v1719_v5 = vld [vmem:[#allocation8 + $0x2d4] ss:$12 sps:$4 sm:$0xff]  }
 0x129   :  { %v220_v19 = vpack.c.bf16 %v216_v8, %v216_v8  ;;  %v222_v54 = vpack.c.bf16 %v218_v50, %v218_v50  ;;  %v1717_v6 = vld [vmem:[#allocation8 + $0x2d0] ss:$12 sps:$4 sm:$0xff]   ;;  %v1722_v7 = vld [vmem:[#allocation8 + $0x2ec] ss:$12 sps:$4 sm:$0xff]   ;;  %v1720_v8 = vld [vmem:[#allocation8 + $0x2e8] ss:$12 sps:$4 sm:$0xff]  }
 0x12a   :  { %v221_v15 = vpack.c.bf16 %v217_v11, %v217_v11  ;;  %v223_v22 = vpack.c.bf16 %v219_v18, %v219_v18  ;;  %v1723_v9 = vld [vmem:[#allocation9 + $0x40] sm:$0xff]   ;;  %v1725_v11 = vld [vmem:[#allocation9 + $0x48] sm:$0xff]   ;;  %v1727_v13 = vld [vmem:[#allocation9 + $0x50] sm:$0xff]  }
 0x12b   :  { %v1724_v10 = vld [vmem:[#allocation9] sm:$0xff]   ;;  %v1726_v12 = vld [vmem:[#allocation9 + $0x8] sm:$0xff]   ;;  %v1728_v14 = vld [vmem:[#allocation9 + $0x10] sm:$0xff]  }
 0x12c   :  { %912 = vmatprep.mubr.bf16.mxu0 %v221_v15  ;;  %994 = vmatprep.mubr.bf16.mxu1 %v221_v15  ;;  %v1729_v15 = vld [vmem:[#allocation9 + $0x58] sm:$0xff]   ;;  %v1732_v18 = vld [vmem:[#allocation9 + $0x20] sm:$0xff]  }
 0x12d   :  { %913 = vmatmul.mubr.bf16.vlgmr.msra.gmra.mrb[4].mxu0 %v220_v19  ;;  %995 = vmatmul.mubr.bf16.vlgmr.msra.gmra.mrb[4].mxu1 %v220_v19  ;;  %v1733_v19 = vld [vmem:[#allocation9 + $0x68] sm:$0xff]  }
 0x12e   :  { %922 = vmatpush1.bf16.msra.mxu0 %v1659_v16  ;;  %1497 = vmatpush3.bf16.msra.mxu1 %v1663_v17  ;;  %v1730_v16 = vld [vmem:[#allocation9 + $0x18] sm:$0xff]   ;;  %v1731_v17 = vld [vmem:[#allocation9 + $0x60] sm:$0xff]  }
 0x12f   :  { %923 = vmatprep.subr.bf16.mxu0 %v1666_v20  ;;  %1498 = vmatprep.subr.bf16.mxu1 %v1667_v21  ;;  %v1734_v20 = vld [vmem:[#allocation9 + $0x28] sm:$0xff]   ;;  %v1735_v21 = vld [vmem:[#allocation9 + $0x70] sm:$0xff]  }
 0x130   :  { %1034 = vmatprep.mubr.bf16.mxu1 %v223_v22  ;;  %953 = vmatprep.mubr.bf16.mxu0 %v223_v22  ;;  %v1736_v22 = vld [vmem:[#allocation9 + $0x30] sm:$0xff]  }
 0x132   :  { %924 = vmatpush1.bf16.msra.mxu0 %v1664_v23  ;;  %1499 = vmatpush3.bf16.msra.mxu1 %v1668_v24  ;;  %v1737_v23 = vld [vmem:[#allocation9 + $0x78] sm:$0xff]  }
 0x133   :  { %925 = vmatprep.subr.bf16.mxu0 %v1671_v25  ;;  %1500 = vmatprep.subr.bf16.mxu1 %v1672_v26  ;;  %v1738_v24 = vld [vmem:[#allocation9 + $0x38] sm:$0xff]   ;;  %v1878_v25 = vmov 0.0  }
 0x136   :  { %926 = vmatpush1.bf16.msra.mxu0 %v1669_v27  ;;  %1501 = vmatpush3.bf16.msra.mxu1 %v1673_v28 }
 0x137   :  { %927 = vmatprep.subr.bf16.mxu0 %v1676_v29  ;;  %1502 = vmatprep.subr.bf16.mxu1 %v1677_v30 }
 0x13a   :  { %928 = vmatpush1.bf16.msra.mxu0 %v1674_v31  ;;  %1503 = vmatpush3.bf16.msra.mxu1 %v1678_v32  ;;  %v81_v31 = vld [vmem:[%s2020_s5 + $0x4] sm:$0x7] }
 0x13b   :  { %929 = vmatprep.subr.bf16.mxu0 %v1681_v33  ;;  %1504 = vmatprep.subr.bf16.mxu1 %v1682_v34  ;;  %v364_v32 = vrot.slane %v81_v31, %v100_v35 }
 0x13e   :  { %930 = vmatpush1.bf16.msra.mxu0 %v1679_v36  ;;  %1505 = vmatpush3.bf16.msra.mxu1 %v1683_v37 }
 0x13f   :  { %931 = vmatprep.subr.bf16.mxu0 %v1686_v38  ;;  %1506 = vmatprep.subr.bf16.mxu1 %v1687_v39 }
 0x142   :  { %932 = vmatpush1.bf16.msra.mxu0 %v1684_v41  ;;  %1507 = vmatpush3.bf16.msra.mxu1 %v1688_v42  ;;  %v356_v41 = vrot.slane %v81_v31, %v92_v59  ;;  %v360_v42 = vrot.slane %v81_v31, %v96_v61  ;;  %v1742_v59 = vld [vmem:[#allocation9 + $0x98] sm:$0xff]   ;;  %v1743_v61 = vld [vmem:[#allocation9 + $0xa0] sm:$0xff]  }
 0x143   :  { %933 = vmatprep.subr.bf16.mxu0 %v1691_v43  ;;  %1508 = vmatprep.subr.bf16.mxu1 %v1692_v44 }
 0x146   :  { %934 = vmatpush1.bf16.msra.mxu0 %v1689_v46  ;;  %1509 = vmatpush3.bf16.msra.mxu1 %v1693_v47 }
 0x147   :  { %935 = vmatprep.subr.bf16.mxu0 %v1696_v48  ;;  %1510 = vmatprep.subr.bf16.mxu1 %v1697_v49 }
 0x14a   :  { %936 = vmatpush1.bf16.msra.mxu0 %v1694_v51  ;;  %1511 = vmatpush3.bf16.msra.mxu1 %v1698_v52  ;;  %v1739_v51 = vld [vmem:[#allocation9 + $0x80] sm:$0xff]  }
 0x14b   :  { %937 = vmatprep.subr.bf16.mxu0 %v1701_v53  ;;  %1518 = vmatprep.subr.bf16.mxu1 %v1723_v9  ;;  %v1740_v53 = vld [vmem:[#allocation9 + $0x88] sm:$0xff]  }
 0x14d   :  { %1035 = vmatmul.mubr.bf16.vlgmr.msra.gmra.mrb[8].mxu1 %v222_v54 }
 0x14e   :  { %938 = vmatpush1.bf16.msra.mxu0 %v1699_v55  ;;  %1519 = vmatpush3.bf16.msra.mxu1 %v1724_v10  ;;  %v1745_v55 = vld [vmem:[#allocation9 + $0xb0] sm:$0xff]   ;;  %v1327_v10 = vstv %s2015_s0 }
 0x14f   :  { %939 = vmatprep.subr.bf16.mxu0 %v1704_v56  ;;  %1520 = vmatprep.subr.bf16.mxu1 %v1725_v11  ;;  %v1746_v56 = vld [vmem:[#allocation9 + $0xb8] sm:$0xff]  }
 0x152   :  { %940 = vmatpush1.bf16.msra.mxu0 %v1702_v57  ;;  %1521 = vmatpush3.bf16.msra.mxu1 %v1726_v12 }
 0x153   :  { %941 = vmatprep.subr.bf16.mxu0 %v1707_v60  ;;  %1522 = vmatprep.subr.bf16.mxu1 %v1727_v13 }
 0x156   :  { %942 = vmatpush1.bf16.msra.mxu0 %v1705_v62  ;;  %1523 = vmatpush3.bf16.msra.mxu1 %v1728_v14 }
 0x157   :  { %943 = vmatprep.subr.bf16.mxu0 %v1710_v63  ;;  %1524 = vmatprep.subr.bf16.mxu1 %v1729_v15 }
 0x15a   :  { %944 = vmatpush1.bf16.msra.mxu0 %v1708_v0  ;;  %1525 = vmatpush3.bf16.msra.mxu1 %v1730_v16 }
 0x15b   :  { %945 = vmatprep.subr.bf16.mxu0 %v1713_v1  ;;  %1526 = vmatprep.subr.bf16.mxu1 %v1731_v17 }
 0x15e   :  { %946 = vmatpush1.bf16.msra.mxu0 %v1711_v2  ;;  %1527 = vmatpush3.bf16.msra.mxu1 %v1732_v18 }
 0x15f   :  { %947 = vmatprep.subr.bf16.mxu0 %v1716_v3  ;;  %1528 = vmatprep.subr.bf16.mxu1 %v1733_v19  ;;  %v1449_v3 = vld [vmem:[%s2020_s5 + $0x7] ss:$0 sm:$0xff] }
 0x162   :  { %948 = vmatpush1.bf16.msra.mxu0 %v1714_v4  ;;  %1529 = vmatpush3.bf16.msra.mxu1 %v1734_v20 }
 0x163   :  { %949 = vmatprep.subr.bf16.mxu0 %v1719_v5  ;;  %1530 = vmatprep.subr.bf16.mxu1 %v1735_v21 }
 0x166   :  { %950 = vmatpush1.bf16.msra.mxu0 %v1717_v6  ;;  %1531 = vmatpush3.bf16.msra.mxu1 %v1736_v22 }
 0x167   :  { %951 = vmatprep.subr.bf16.mxu0 %v1722_v7  ;;  %1532 = vmatprep.subr.bf16.mxu1 %v1737_v23 }
 0x16a   :  { %952 = vmatpush1.bf16.msra.mxu0 %v1720_v8  ;;  %1533 = vmatpush3.bf16.msra.mxu1 %v1738_v24 }
 0x16b   :  { %1549 = vmatprep.subr.bf16.mxu1 %v1878_v25 }
 0x16d   :  { %954 = vmatmul.mubr.bf16.vlgmr.msra.gmra.mrb[4].mxu0 %v222_v54  ;;  %v1744_v54 = vld [vmem:[#allocation9 + $0xa8] sm:$0xff]  }
 0x200   :  { %v1490_v26 = vpop.f32.mrb[4].mxu1 }
 0x201   :  { %v1491_v27 = vpop.f32.mrb[5].mxu1 }
 0x202   :  { %v1492_v28 = vadd.f32 %v1491_v27, %v1490_v26  ;;  %v1493_v29 = vpop.f32.mrb[6].mxu1 }
 0x203   :  { %v1494_v30 = vpop.f32.mrb[7].mxu1 }
 0x204   :  { %v997_v36 = vadd.f32 %v1492_v28, %v364_v32 }
 0x220   :  { %v1512_v33 = vpop.f32.mrb[8].mxu1 }
 0x221   :  { %v1513_v34 = vpop.f32.mrb[9].mxu1 }
 0x222   :  { %v1514_v37 = vadd.f32 %v1513_v34, %v1512_v33  ;;  %v1515_v38 = vpop.f32.mrb[10].mxu1 }
 0x223   :  { %v1516_v39 = vpop.f32.mrb[11].mxu1 }
 0x224   :  { %v1037_v40 = vadd.f32 %v1514_v37, %v997_v36 }
 0x226   :  { %v1044_v57 = vmax.f32 %v1037_v40, 0.0 }
 0x228   :  { %v1047_v60 = vpack.c.bf16 %v1044_v57, %v1044_v57 }
 0x240   :  { %v955_v43 = vpop.f32.mrb[4].mxu0 }
 0x241   :  { %v1569_v44 = vadd.f32 %v955_v43, %v356_v41  ;;  %v957_v45 = vpop.f32.mrb[5].mxu0 }
 0x242   :  { %v1570_v46 = vadd.f32 %v957_v45, %v360_v42  ;;  %v959_v47 = vpop.f32.mrb[6].mxu0 }
 0x243   :  { %v1042_v48 = vmax.f32 %v1569_v44, 0.0  ;;  %v960_v35 = vpop.f32.mrb[7].mxu0 }
 0x244   :  { %v1043_v49 = vmax.f32 %v1570_v46, 0.0 }
 0x245   :  { %v1045_v52 = vpack.c.bf16 %v1042_v48, %v1042_v48 }
 0x246   :  { %v1046_v50 = vpack.c.bf16 %v1043_v49, %v1043_v49 }
 0x248   :  { %1278 = vmatprep.mubr.bf16.mxu1 %v1046_v50 }
 0x249   :  { %1279 = vmatmul.mubr.bf16.vlgmr.msra.gmra.mrb[12].mxu1 %v1045_v52 }
 0x24a   :  { %1550 = vmatpush3.bf16.msra.mxu1 %v1739_v51  ;;  %1565 = vmatprep.mubr.msk.bf16.mxu1 %vm1879_vm1, %v1878_v25 }
 0x24b   :  { %1551 = vmatprep.subr.bf16.mxu1 %v1878_v25 }
 0x24e   :  { %1552 = vmatpush3.bf16.msra.mxu1 %v1740_v53 }
 0x24f   :  { %1553 = vmatprep.subr.bf16.mxu1 %v1878_v25 }
 0x252   :  { %1554 = vmatpush3.bf16.msra.mxu1 %v1741_v58 }
 0x253   :  { %1555 = vmatprep.subr.bf16.mxu1 %v1878_v25 }
 0x256   :  { %1556 = vmatpush3.bf16.msra.mxu1 %v1742_v59 }
 0x257   :  { %1557 = vmatprep.subr.bf16.mxu1 %v1878_v25 }
 0x25a   :  { %1558 = vmatpush3.bf16.msra.mxu1 %v1743_v61 }
 0x25b   :  { %1559 = vmatprep.subr.bf16.mxu1 %v1878_v25 }
 0x25e   :  { %1560 = vmatpush3.bf16.msra.mxu1 %v1744_v54 }
 0x25f   :  { %1561 = vmatprep.subr.bf16.mxu1 %v1878_v25 }
 0x262   :  { %1562 = vmatpush3.bf16.msra.mxu1 %v1745_v55 }
 0x263   :  { %1563 = vmatprep.subr.bf16.mxu1 %v1878_v25 }
 0x266   :  { %1564 = vmatpush3.bf16.msra.mxu1 %v1746_v56 }
 0x269   :  { %1566 = vmatmul.mubr.bf16.vlgmr.msra.gmra.mrb[16].mxu1 %v1047_v60 }
 0x31c   :  { %v1534_v62 = vpop.f32.mrb[12].mxu1 }
 0x31d   :  { %v1535_v63 = vpop.f32.mrb[13].mxu1 }
 0x31e   :  { %v1536_v0 = vadd.f32 %v1535_v63, %v1534_v62  ;;  %v1537_v1 = vpop.f32.mrb[14].mxu1 }
 0x31f   :  { %v1538_v2 = vpop.f32.mrb[15].mxu1 }
 0x320   :  { %v1281_v4 = vadd.f32 %v1536_v0, %v1449_v3 }
 0x33c   :  { %v1320_v5 = vpop.f32.mrb[16].mxu1 }
 0x33d   :  { %v1321_v6 = vadd.f32 %v1320_v5, %v1281_v4  ;;  %v1567_v7 = vpop.f32.mrb[17].mxu1 }
 0x33e   :  { %v1323_v8 = vpop.f32.mrb[18].mxu1 }
 0x33f   :  { %1747 = vtanh.f32 %v1321_v6  ;;  %v1568_v9 = vpop.f32.mrb[19].mxu1 }
 0x349   :  { %v1748_v11 = vpop.eup %1747 }
 0x34a   :  { %v1328_v12 = vmul.f32 %v1748_v11, %v1327_v10 }
 0x34c   :  { %1329 = vst [vmem:[#allocation11] sm:$0xff] %v1328_v12 }
 0x34d   :  { %1848 = shalt.err (!%p1845_p8)
}
 0x34e   :  { %s1849_s9 = scalar_lea.hbm %s2021_s6, 128 }
 0x34f   :  { %p1850_p9 = scmp.ne.s32.totalorder %s2021_s6, %s1849_s9  ;;  %p1853_p10 = scmp.lt.u32.totalorder %s1849_s9, %s2021_s6 }
 0x351   :  { %p1855_p11 = pnand %p1853_p10, %p1850_p9 }
 0x353   :  { %1858 = shalt.err (!%p1855_p11)
}
 0x354   :  { %1339 = dma.vmem_to_hbm [thread:$0]  %s1337_s7, 128, %s2021_s6, [#allocation5]  }
 0x355   :  { %1865 = dma.done.wait [#allocation5], 128  }
 0x356   :  { %1866 = vsyncadd [#allocation5], 4294967168 }
 0x357   :  { %1343 = vsyncpa [#allocation4], 1 }
 0x358   :  { %1344 = vsyncpa [#allocation7], 1 }
 0x359   :  { %1345 = vsyncpa [#allocation10], 1 }
 0x35a   :  { %1346 = vsyncpa [#allocation5], 1 }

</bundles_post_ra>
